<compile_context>
chip_gen: v7x
topology: tpu7x:2x2x1
jax: 0.10.0
libtpu: 0.0.40
codegen_flags: <defaults>
</compile_context>

<pallas_src>
import jax
import jax.numpy as jnp
from jax.experimental import pallas as pl
from jax.experimental.pallas import tpu as pltpu


# Padded feature sizes (lane-aligned).  Padding is applied OFFLINE to the
# weights/biases in prepare_params; padded rows/cols are exactly zero, so
# padded hidden units stay zero through bias + ReLU.
D_IN = 784          # kept as-is: block last dim == full array dim is allowed
H1_PAD = 256        # 200 -> 256
H2_PAD = 128        # 100 -> 128
OUT_PAD = 128       # layer-3 RHS padded to 128 columns (MXU/lane layout)
OUT_REAL = 10       # real number of logits; output array is (B, 10)


def _mlp_kernel(x_ref, w1_ref, b1_ref, w2_ref, b2_ref, w3_ref, b3_ref, o_ref):
    # x tile arrives in its native dtype (f32 from the host); cast to bf16
    # in-kernel so no separate HBM cast pass is needed.
    x = x_ref[...].astype(jnp.bfloat16)
    h1 = jnp.dot(x, w1_ref[...], preferred_element_type=jnp.float32)
    h1 = jnp.maximum(h1 + b1_ref[...], 0.0)                       # (TB, 256) f32
    h2 = jnp.dot(h1.astype(jnp.bfloat16), w2_ref[...],
                 preferred_element_type=jnp.float32)
    h2 = jnp.maximum(h2 + b2_ref[...], 0.0)                       # (TB, 128) f32
    o = jnp.dot(h2.astype(jnp.bfloat16), w3_ref[...],
                preferred_element_type=jnp.float32)
    o = o + b3_ref[...]                                           # (TB, 128) f32
    # Masked store of the 10 real logit columns (output block is (TB, 10)).
    o_ref[...] = o[:, :OUT_REAL].astype(o_ref.dtype)


def _round_up(x, m):
    return ((x + m - 1) // m) * m


def _pick_tile(batch, tb):
    """Choose the batch tile.  Block dims must be divisible by 8 or equal the
    full array dim."""
    if batch > tb:
        return tb                       # grid has >= 2 steps naturally
    if batch >= 512:
        # Split medium batches into 2 tiles so both v7x TensorCores get work.
        return _round_up(pl.cdiv(batch, 2), 8)
    return batch                        # tiny batch: single full block


def fedavg_mlp_forward(x, prepared_params, *, tb=1024):
    """x: (B, 1, 28, 28) or (B, 784), float32 (or bf16).  Returns (B, 10) f32."""
    if x.ndim == 4:
        x = x.reshape(x.shape[0], -1)   # torch x.view(B, -1); dtype untouched
    B = x.shape[0]

    w1, b1, w2, b2, w3, b3 = prepared_params

    TB = _pick_tile(B, tb)
    grid = (pl.cdiv(B, TB),)

    const_shapes = [(D_IN, H1_PAD), (1, H1_PAD),
                    (H1_PAD, H2_PAD), (1, H2_PAD),
                    (H2_PAD, OUT_PAD), (1, OUT_PAD)]

    def build(single_buffer_consts):
        # Weights / biases: constant index maps -> resident in VMEM, DMA'd once.
        if single_buffer_consts:
            const = lambda s: pl.BlockSpec(s, lambda i: (0, 0),
                                           pipeline_mode=pl.Buffered(1))
        else:
            const = lambda s: pl.BlockSpec(s, lambda i: (0, 0))
        return pl.pallas_call(
            _mlp_kernel,
            out_shape=jax.ShapeDtypeStruct((B, OUT_REAL), jnp.float32),
            grid=grid,
            in_specs=[pl.BlockSpec((TB, D_IN), lambda i: (i, 0))]   # streamed x
                     + [const(s) for s in const_shapes],
            out_specs=pl.BlockSpec((TB, OUT_REAL), lambda i: (i, 0)),
            compiler_params=pltpu.CompilerParams(
                dimension_semantics=("parallel",)),                 # v7x: 2 TCs
        )

    try:
        return build(True)(x, w1, b1, w2, b2, w3, b3)
    except Exception:
        # pl.Buffered(1) not supported on this build: fall back to default
        # double-buffered constant specs (only ~0.5 MiB extra VMEM).
        return build(False)(x, w1, b1, w2, b2, w3, b3)


def init_params(key):
    """Deterministic init, shapes from FedAvgMLP.__init__ (weights as (in, out))."""
    ks = jax.random.split(key, 6)

    def linear(kw, kb, fan_in, fan_out):
        bound = 1.0 / jnp.sqrt(fan_in)
        w = jax.random.uniform(kw, (fan_in, fan_out), jnp.float32, -bound, bound)
        b = jax.random.uniform(kb, (1, fan_out), jnp.float32, -bound, bound)
        return w, b

    w1, b1 = linear(ks[0], ks[1], 784, 200)
    w2, b2 = linear(ks[2], ks[3], 200, 100)
    w3, b3 = linear(ks[4], ks[5], 100, 10)
    return (w1, b1, w2, b2, w3, b3)


def prepare_params(params):
    """Offline preprocessing: zero-pad feature dims to lane multiples and cast
    weights to bf16 (biases stay f32 for the f32 epilogue)."""
    w1, b1, w2, b2, w3, b3 = params

    def pad2(a, shape):
        out = jnp.zeros(shape, a.dtype)
        return out.at[: a.shape[0], : a.shape[1]].set(a)

    w1p = pad2(w1, (D_IN, H1_PAD)).astype(jnp.bfloat16)
    b1p = pad2(b1, (1, H1_PAD))
    w2p = pad2(w2, (H1_PAD, H2_PAD)).astype(jnp.bfloat16)
    b2p = pad2(b2, (1, H2_PAD))
    w3p = pad2(w3, (H2_PAD, OUT_PAD)).astype(jnp.bfloat16)
    b3p = pad2(b3, (1, OUT_PAD))
    return (w1p, b1p, w2p, b2p, w3p, b3p)


def reference_forward(x, params):
    """Pure-JAX reference mirroring the kernel's precision path
    (bf16 matmul operands, f32 accumulation, f32 bias/ReLU)."""
    if x.ndim == 4:
        x = x.reshape(x.shape[0], -1)
    w1, b1, w2, b2, w3, b3 = params
    bf = jnp.bfloat16
    h1 = jnp.maximum(
        jnp.dot(x.astype(bf), w1.astype(bf),
                preferred_element_type=jnp.float32) + b1, 0.0)
    h2 = jnp.maximum(
        jnp.dot(h1.astype(bf), w2.astype(bf),
                preferred_element_type=jnp.float32) + b2, 0.0)
    return jnp.dot(h2.astype(bf), w3.astype(bf),
                   preferred_element_type=jnp.float32) + b3


if __name__ == "__main__":
    key = jax.random.PRNGKey(0)
    k_params, k_x = jax.random.split(key)

    params = init_params(k_params)
    prepared = prepare_params(params)
    x = jax.random.normal(k_x, (2, 1, 28, 28), jnp.float32)  # NCHW, MNIST-like

    out = fedavg_mlp_forward(x, prepared)
    out = jax.block_until_ready(out)

    ref = reference_forward(x, params)
    assert out.shape == (2, 10)
    assert jnp.allclose(out, ref, atol=1e-2, rtol=1e-2), (
        f"max abs err {jnp.max(jnp.abs(out - ref))}")

    print("KERNEL_OK")
</pallas_src>

<mosaic_0001>
module attributes {stable_mosaic.version = 11 : i64} {
  func.func @_mlp_kernel(%arg0: i32, %arg1: memref<2x784xf32, #tpu.memory_space<vmem>>, %arg2: memref<784x256xbf16, #tpu.memory_space<vmem>>, %arg3: memref<1x256xf32, #tpu.memory_space<vmem>>, %arg4: memref<256x128xbf16, #tpu.memory_space<vmem>>, %arg5: memref<1x128xf32, #tpu.memory_space<vmem>>, %arg6: memref<128x128xbf16, #tpu.memory_space<vmem>>, %arg7: memref<1x128xf32, #tpu.memory_space<vmem>>, %arg8: memref<2x10xf32, #tpu.memory_space<vmem>>) attributes {dimension_semantics = [#tpu.dimension_semantics<parallel>], iteration_bounds = array<i64: 1>, scalar_prefetch = 0 : i64, scratch_operands = 0 : i64, tpu.core_type = #tpu.core_type<tc>, window_params = [{transform_indices = @transform_0, window_bounds = array<i64: 2, 784>}, {pipeline_mode = #tpu.pipeline_mode<synchronous>, transform_indices = @transform_1, window_bounds = array<i64: 784, 256>}, {pipeline_mode = #tpu.pipeline_mode<synchronous>, transform_indices = @transform_2, window_bounds = array<i64: 1, 256>}, {pipeline_mode = #tpu.pipeline_mode<synchronous>, transform_indices = @transform_3, window_bounds = array<i64: 256, 128>}, {pipeline_mode = #tpu.pipeline_mode<synchronous>, transform_indices = @transform_4, window_bounds = array<i64: 1, 128>}, {pipeline_mode = #tpu.pipeline_mode<synchronous>, transform_indices = @transform_5, window_bounds = array<i64: 128, 128>}, {pipeline_mode = #tpu.pipeline_mode<synchronous>, transform_indices = @transform_6, window_bounds = array<i64: 1, 128>}, {transform_indices = @transform_7, window_bounds = array<i64: 2, 10>}]} {
    %c0 = arith.constant 0 : index
    %c0_0 = arith.constant 0 : index
    %0 = vector.load %arg1[%c0, %c0_0] : memref<2x784xf32, #tpu.memory_space<vmem>>, vector<2x784xf32>
    %1 = arith.truncf %0 : vector<2x784xf32> to vector<2x784xbf16>
    %c0_1 = arith.constant 0 : index
    %c0_2 = arith.constant 0 : index
    %2 = vector.load %arg2[%c0_1, %c0_2] : memref<784x256xbf16, #tpu.memory_space<vmem>>, vector<784x256xbf16>
    %cst = arith.constant dense<0.000000e+00> : vector<2x256xf32>
    %3 = tpu.matmul %1, %2, %cst {dimension_numbers = #tpu.dot_dimension_numbers<[1], [0], [0], [1], [0, 0, 1, 1], [], []>} : vector<2x784xbf16>, vector<784x256xbf16>, vector<2x256xf32> -> vector<2x256xf32>
    %c0_3 = arith.constant 0 : index
    %c0_4 = arith.constant 0 : index
    %4 = vector.load %arg3[%c0_3, %c0_4] : memref<1x256xf32, #tpu.memory_space<vmem>>, vector<1x256xf32>
    %5 = vector.broadcast %4 : vector<1x256xf32> to vector<2x256xf32>
    %6 = arith.addf %3, %5 : vector<2x256xf32>
    %cst_5 = arith.constant 0.000000e+00 : f32
    %7 = vector.broadcast %cst_5 : f32 to vector<2x256xf32>
    %8 = arith.maximumf %6, %7 : vector<2x256xf32>
    %9 = arith.truncf %8 : vector<2x256xf32> to vector<2x256xbf16>
    %c0_6 = arith.constant 0 : index
    %c0_7 = arith.constant 0 : index
    %10 = vector.load %arg4[%c0_6, %c0_7] : memref<256x128xbf16, #tpu.memory_space<vmem>>, vector<256x128xbf16>
    %cst_8 = arith.constant dense<0.000000e+00> : vector<2x128xf32>
    %11 = tpu.matmul %9, %10, %cst_8 {dimension_numbers = #tpu.dot_dimension_numbers<[1], [0], [0], [1], [0, 0, 1, 1], [], []>} : vector<2x256xbf16>, vector<256x128xbf16>, vector<2x128xf32> -> vector<2x128xf32>
    %c0_9 = arith.constant 0 : index
    %c0_10 = arith.constant 0 : index
    %12 = vector.load %arg5[%c0_9, %c0_10] : memref<1x128xf32, #tpu.memory_space<vmem>>, vector<1x128xf32>
    %13 = vector.broadcast %12 : vector<1x128xf32> to vector<2x128xf32>
    %14 = arith.addf %11, %13 : vector<2x128xf32>
    %cst_11 = arith.constant 0.000000e+00 : f32
    %15 = vector.broadcast %cst_11 : f32 to vector<2x128xf32>
    %16 = arith.maximumf %14, %15 : vector<2x128xf32>
    %17 = arith.truncf %16 : vector<2x128xf32> to vector<2x128xbf16>
    %c0_12 = arith.constant 0 : index
    %c0_13 = arith.constant 0 : index
    %18 = vector.load %arg6[%c0_12, %c0_13] : memref<128x128xbf16, #tpu.memory_space<vmem>>, vector<128x128xbf16>
    %cst_14 = arith.constant dense<0.000000e+00> : vector<2x128xf32>
    %19 = tpu.matmul %17, %18, %cst_14 {dimension_numbers = #tpu.dot_dimension_numbers<[1], [0], [0], [1], [0, 0, 1, 1], [], []>} : vector<2x128xbf16>, vector<128x128xbf16>, vector<2x128xf32> -> vector<2x128xf32>
    %c0_15 = arith.constant 0 : index
    %c0_16 = arith.constant 0 : index
    %20 = vector.load %arg7[%c0_15, %c0_16] : memref<1x128xf32, #tpu.memory_space<vmem>>, vector<1x128xf32>
    %21 = vector.broadcast %20 : vector<1x128xf32> to vector<2x128xf32>
    %22 = arith.addf %19, %21 : vector<2x128xf32>
    %23 = vector.extract_strided_slice %22 {offsets = [0, 0], sizes = [2, 10], strides = [1, 1]} : vector<2x128xf32> to vector<2x10xf32>
    %c0_17 = arith.constant 0 : index
    %c0_18 = arith.constant 0 : index
    %24 = vector.load %arg8[%c0_17, %c0_18] : memref<2x10xf32, #tpu.memory_space<vmem>>, vector<2x10xf32>
    tpu.vector_store %arg8[%c0_17, %c0_18], %23 {strides = array<i32>} : memref<2x10xf32, #tpu.memory_space<vmem>>, vector<2x10xf32>,
    return
  }
  func.func @transform_0(%arg0: i32) -> (i32, i32) {
    %c0_i32 = arith.constant 0 : i32
    %c0_i32_0 = arith.constant 0 : i32
    return %arg0, %c0_i32 : i32, i32
  }
  func.func @transform_1(%arg0: i32) -> (i32, i32) {
    %c0_i32 = arith.constant 0 : i32
    %c0_i32_0 = arith.constant 0 : i32
    %c0_i32_1 = arith.constant 0 : i32
    return %c0_i32, %c0_i32_0 : i32, i32
  }
  func.func @transform_2(%arg0: i32) -> (i32, i32) {
    %c0_i32 = arith.constant 0 : i32
    %c0_i32_0 = arith.constant 0 : i32
    %c0_i32_1 = arith.constant 0 : i32
    return %c0_i32, %c0_i32_0 : i32, i32
  }
  func.func @transform_3(%arg0: i32) -> (i32, i32) {
    %c0_i32 = arith.constant 0 : i32
    %c0_i32_0 = arith.constant 0 : i32
    %c0_i32_1 = arith.constant 0 : i32
    return %c0_i32, %c0_i32_0 : i32, i32
  }
  func.func @transform_4(%arg0: i32) -> (i32, i32) {
    %c0_i32 = arith.constant 0 : i32
    %c0_i32_0 = arith.constant 0 : i32
    %c0_i32_1 = arith.constant 0 : i32
    return %c0_i32, %c0_i32_0 : i32, i32
  }
  func.func @transform_5(%arg0: i32) -> (i32, i32) {
    %c0_i32 = arith.constant 0 : i32
    %c0_i32_0 = arith.constant 0 : i32
    %c0_i32_1 = arith.constant 0 : i32
    return %c0_i32, %c0_i32_0 : i32, i32
  }
  func.func @transform_6(%arg0: i32) -> (i32, i32) {
    %c0_i32 = arith.constant 0 : i32
    %c0_i32_0 = arith.constant 0 : i32
    %c0_i32_1 = arith.constant 0 : i32
    return %c0_i32, %c0_i32_0 : i32, i32
  }
  func.func @transform_7(%arg0: i32) -> (i32, i32) {
    %c0_i32 = arith.constant 0 : i32
    %c0_i32_0 = arith.constant 0 : i32
    return %arg0, %c0_i32 : i32, i32
  }
}

module attributes {stable_mosaic.version = 11 : i64} {
  func.func @_mlp_kernel(%arg0: i32, %arg1: memref<2x784xf32, #tpu.memory_space<vmem>>, %arg2: memref<784x256xbf16, #tpu.memory_space<vmem>>, %arg3: memref<1x256xf32, #tpu.memory_space<vmem>>, %arg4: memref<256x128xbf16, #tpu.memory_space<vmem>>, %arg5: memref<1x128xf32, #tpu.memory_space<vmem>>, %arg6: memref<128x128xbf16, #tpu.memory_space<vmem>>, %arg7: memref<1x128xf32, #tpu.memory_space<vmem>>, %arg8: memref<2x10xf32, #tpu.memory_space<vmem>>) attributes {dimension_semantics = [#tpu.dimension_semantics<parallel>], iteration_bounds = array<i64: 1>, scalar_prefetch = 0 : i64, scratch_operands = 0 : i64, tpu.core_type = #tpu.core_type<tc>, window_params = [{transform_indices = @transform_0, window_bounds = array<i64: 2, 784>}, {pipeline_mode = #tpu.pipeline_mode<synchronous>, transform_indices = @transform_1, window_bounds = array<i64: 784, 256>}, {pipeline_mode = #tpu.pipeline_mode<synchronous>, transform_indices = @transform_2, window_bounds = array<i64: 1, 256>}, {pipeline_mode = #tpu.pipeline_mode<synchronous>, transform_indices = @transform_3, window_bounds = array<i64: 256, 128>}, {pipeline_mode = #tpu.pipeline_mode<synchronous>, transform_indices = @transform_4, window_bounds = array<i64: 1, 128>}, {pipeline_mode = #tpu.pipeline_mode<synchronous>, transform_indices = @transform_5, window_bounds = array<i64: 128, 128>}, {pipeline_mode = #tpu.pipeline_mode<synchronous>, transform_indices = @transform_6, window_bounds = array<i64: 1, 128>}, {transform_indices = @transform_7, window_bounds = array<i64: 2, 10>}]} {
    %c0 = arith.constant 0 : index
    %c0_0 = arith.constant 0 : index
    %0 = vector.load %arg1[%c0, %c0_0] : memref<2x784xf32, #tpu.memory_space<vmem>>, vector<2x784xf32>
    %1 = arith.truncf %0 : vector<2x784xf32> to vector<2x784xbf16>
    %c0_1 = arith.constant 0 : index
    %c0_2 = arith.constant 0 : index
    %2 = vector.load %arg2[%c0_1, %c0_2] : memref<784x256xbf16, #tpu.memory_space<vmem>>, vector<784x256xbf16>
    %cst = arith.constant dense<0.000000e+00> : vector<2x256xf32>
    %3 = tpu.matmul %1, %2, %cst {dimension_numbers = #tpu.dot_dimension_numbers<[1], [0], [0], [1], [0, 0, 1, 1], [], []>} : vector<2x784xbf16>, vector<784x256xbf16>, vector<2x256xf32> -> vector<2x256xf32>
    %c0_3 = arith.constant 0 : index
    %c0_4 = arith.constant 0 : index
    %4 = vector.load %arg3[%c0_3, %c0_4] : memref<1x256xf32, #tpu.memory_space<vmem>>, vector<1x256xf32>
    %5 = vector.broadcast %4 : vector<1x256xf32> to vector<2x256xf32>
    %6 = arith.addf %3, %5 : vector<2x256xf32>
    %cst_5 = arith.constant 0.000000e+00 : f32
    %7 = vector.broadcast %cst_5 : f32 to vector<2x256xf32>
    %8 = arith.maximumf %6, %7 : vector<2x256xf32>
    %9 = arith.truncf %8 : vector<2x256xf32> to vector<2x256xbf16>
    %c0_6 = arith.constant 0 : index
    %c0_7 = arith.constant 0 : index
    %10 = vector.load %arg4[%c0_6, %c0_7] : memref<256x128xbf16, #tpu.memory_space<vmem>>, vector<256x128xbf16>
    %cst_8 = arith.constant dense<0.000000e+00> : vector<2x128xf32>
    %11 = tpu.matmul %9, %10, %cst_8 {dimension_numbers = #tpu.dot_dimension_numbers<[1], [0], [0], [1], [0, 0, 1, 1], [], []>} : vector<2x256xbf16>, vector<256x128xbf16>, vector<2x128xf32> -> vector<2x128xf32>
    %c0_9 = arith.constant 0 : index
    %c0_10 = arith.constant 0 : index
    %12 = vector.load %arg5[%c0_9, %c0_10] : memref<1x128xf32, #tpu.memory_space<vmem>>, vector<1x128xf32>
    %13 = vector.broadcast %12 : vector<1x128xf32> to vector<2x128xf32>
    %14 = arith.addf %11, %13 : vector<2x128xf32>
    %cst_11 = arith.constant 0.000000e+00 : f32
    %15 = vector.broadcast %cst_11 : f32 to vector<2x128xf32>
    %16 = arith.maximumf %14, %15 : vector<2x128xf32>
    %17 = arith.truncf %16 : vector<2x128xf32> to vector<2x128xbf16>
    %c0_12 = arith.constant 0 : index
    %c0_13 = arith.constant 0 : index
    %18 = vector.load %arg6[%c0_12, %c0_13] : memref<128x128xbf16, #tpu.memory_space<vmem>>, vector<128x128xbf16>
    %cst_14 = arith.constant dense<0.000000e+00> : vector<2x128xf32>
    %19 = tpu.matmul %17, %18, %cst_14 {dimension_numbers = #tpu.dot_dimension_numbers<[1], [0], [0], [1], [0, 0, 1, 1], [], []>} : vector<2x128xbf16>, vector<128x128xbf16>, vector<2x128xf32> -> vector<2x128xf32>
    %c0_15 = arith.constant 0 : index
    %c0_16 = arith.constant 0 : index
    %20 = vector.load %arg7[%c0_15, %c0_16] : memref<1x128xf32, #tpu.memory_space<vmem>>, vector<1x128xf32>
    %21 = vector.broadcast %20 : vector<1x128xf32> to vector<2x128xf32>
    %22 = arith.addf %19, %21 : vector<2x128xf32>
    %23 = vector.extract_strided_slice %22 {offsets = [0, 0], sizes = [2, 10], strides = [1, 1]} : vector<2x128xf32> to vector<2x10xf32>
    %c0_17 = arith.constant 0 : index
    %c0_18 = arith.constant 0 : index
    %24 = vector.load %arg8[%c0_17, %c0_18] : memref<2x10xf32, #tpu.memory_space<vmem>>, vector<2x10xf32>
    tpu.vector_store %arg8[%c0_17, %c0_18], %23 {strides = array<i32>} : memref<2x10xf32, #tpu.memory_space<vmem>>, vector<2x10xf32>,
    return
  }
  func.func @transform_0(%arg0: i32) -> (i32, i32) {
    %c0_i32 = arith.constant 0 : i32
    %c0_i32_0 = arith.constant 0 : i32
    return %arg0, %c0_i32 : i32, i32
  }
  func.func @transform_1(%arg0: i32) -> (i32, i32) {
    %c0_i32 = arith.constant 0 : i32
    %c0_i32_0 = arith.constant 0 : i32
    %c0_i32_1 = arith.constant 0 : i32
    return %c0_i32, %c0_i32_0 : i32, i32
  }
  func.func @transform_2(%arg0: i32) -> (i32, i32) {
    %c0_i32 = arith.constant 0 : i32
    %c0_i32_0 = arith.constant 0 : i32
    %c0_i32_1 = arith.constant 0 : i32
    return %c0_i32, %c0_i32_0 : i32, i32
  }
  func.func @transform_3(%arg0: i32) -> (i32, i32) {
    %c0_i32 = arith.constant 0 : i32
    %c0_i32_0 = arith.constant 0 : i32
    %c0_i32_1 = arith.constant 0 : i32
    return %c0_i32, %c0_i32_0 : i32, i32
  }
  func.func @transform_4(%arg0: i32) -> (i32, i32) {
    %c0_i32 = arith.constant 0 : i32
    %c0_i32_0 = arith.constant 0 : i32
    %c0_i32_1 = arith.constant 0 : i32
    return %c0_i32, %c0_i32_0 : i32, i32
  }
  func.func @transform_5(%arg0: i32) -> (i32, i32) {
    %c0_i32 = arith.constant 0 : i32
    %c0_i32_0 = arith.constant 0 : i32
    %c0_i32_1 = arith.constant 0 : i32
    return %c0_i32, %c0_i32_0 : i32, i32
  }
  func.func @transform_6(%arg0: i32) -> (i32, i32) {
    %c0_i32 = arith.constant 0 : i32
    %c0_i32_0 = arith.constant 0 : i32
    %c0_i32_1 = arith.constant 0 : i32
    return %c0_i32, %c0_i32_0 : i32, i32
  }
  func.func @transform_7(%arg0: i32) -> (i32, i32) {
    %c0_i32 = arith.constant 0 : i32
    %c0_i32_0 = arith.constant 0 : i32
    return %arg0, %c0_i32 : i32, i32
  }
}

</mosaic_0001>

<bundles_post_ra>
// kernel: tpu_custom_call.1
= control target key start
LH: loop header
LB: loop body
LE: loop exit
PB: predicated region body
PF: predicated region fallthrough
CT: control target
= control target key end

     0   :  { %12 = vsyncpa [#allocation3], 0  ;;  %s1858_s0 = inlined_call_operand.hbm [shape: f32[2,784], index: 0, kind: input, shape index: {}]   ;;  %s1859_s1 = inlined_call_operand.hbm [shape: bf16[784,256], index: 1, kind: input, shape index: {}]   ;;  %s1860_s2 = inlined_call_operand.vmem [shape: f32[1,256], index: 2, kind: input, shape index: {}]   ;;  %s1861_s3 = inlined_call_operand.hbm [shape: bf16[256,128], index: 3, kind: input, shape index: {}]   ;;  %s1862_s4 = inlined_call_operand.vmem [shape: f32[1,128], index: 4, kind: input, shape index: {}]   ;;  %s1863_s5 = inlined_call_operand.hbm [shape: bf16[128,128], index: 5, kind: input, shape index: {}]   ;;  %s1864_s6 = inlined_call_operand.vmem [shape: f32[1,128], index: 6, kind: input, shape index: {}]   ;;  %s1865_s7 = inlined_call_operand.hbm [shape: f32[2,10], index: 7, kind: output, shape index: {}]  }
   0x1   :  { %13 = vsyncpa [#allocation6], 0 }
   0x2   :  { %14 = vsyncpa [#allocation9], 0 }
   0x3   :  { %15 = vsyncpa [#allocation4], 0  ;;  %s1703_s24 = smov [#allocation5]   ;;  %s1585_s28 = scalar_lea.hbm %s1859_s1, 12544 }
   0x4   :  { %s31_s25 = sshll.u32 %s1703_s24, 4  ;;  %p1586_p0 = scmp.ne.s32.totalorder %s1859_s1, %s1585_s28  ;;  %s32_s25 = int_to_ptr.vmem [resolvable:$true] %s31_s25 }
   0x5   :  { %p1589_p1 = scmp.lt.u32.totalorder %s1585_s28, %s1859_s1 }
   0x7   :  { %p1591_p2 = pnand %p1589_p1, %p1586_p0 }
   0x9   :  { %1594 = shalt.err (!%p1591_p2)
}
   0xa   :  { %s1595_s10 = scalar_lea.vmem %s32_s25, 12544  ;;  %p1600_p4 = scmp.lt.s32.totalorder %s32_s25, %s32_s25 }
   0xb   :  { %p1596_p3 = scmp.ne.s32.totalorder %s32_s25, %s1595_s10  ;;  %p1601_p5 = scmp.lt.s32.totalorder %s1595_s10, %s1595_s10 }
   0xd   :  { %p1602_p6 = por %p1601_p5, %p1600_p4 }
   0xf   :  { %p1603_p7 = pnand %p1602_p6, %p1596_p3 }
  0x11   :  { %1606 = shalt.err (!%p1603_p7)
}
  0x12   :  { %s1704_s11 = smov 128   ;;  %s1705_s12 = smov 8  }
  0x13   :  { %37 = dma.hbm_to_vmem [thread:$0]  %s1859_s1, 12544, %s32_s25, [#allocation6], %s1704_s11, %s1704_s11, %s1705_s12  }
  0x14   :  { %s1706_s15 = smov [#allocation2]   ;;  %s1707_s17 = smov [#allocation7]  }
  0x15   :  { %s22_s16 = sshll.u32 %s1706_s15, 4  ;;  %s45_s18 = sshll.u32 %s1707_s17, 4  ;;  %s23_s16 = int_to_ptr.vmem [resolvable:$true] %s22_s16  ;;  %s46_s18 = int_to_ptr.vmem [resolvable:$true] %s45_s18 }
  0x16   :  { %s1607_s21 = scalar_lea.hbm %s1858_s0, 224 }
  0x17   :  { %p1608_p8 = scmp.ne.s32.totalorder %s1858_s0, %s1607_s21  ;;  %p1611_p9 = scmp.lt.u32.totalorder %s1607_s21, %s1858_s0 }
  0x19   :  { %p1613_p10 = pnand %p1611_p9, %p1608_p8 }
  0x1b   :  { %1616 = shalt.err (!%p1613_p10)
}
  0x1c   :  { %s1617_s1 = scalar_lea.vmem %s23_s16, 224  ;;  %p1622_p12 = scmp.lt.s32.totalorder %s23_s16, %s23_s16 }
  0x1d   :  { %p1618_p11 = scmp.ne.s32.totalorder %s23_s16, %s1617_s1  ;;  %p1623_p13 = scmp.lt.s32.totalorder %s1617_s1, %s1617_s1 }
  0x1f   :  { %p1624_p0 = por %p1623_p13, %p1622_p12 }
  0x21   :  { %p1625_p1 = pnand %p1624_p0, %p1618_p11 }
  0x23   :  { %1628 = shalt.err (!%p1625_p1)
}
  0x24   :  { %25 = dma.hbm_to_vmem [thread:$0]  %s1858_s0, 224, %s23_s16, [#allocation3]  }
  0x25   :  { %s1629_s30 = scalar_lea.hbm %s1861_s3, 2048 }
  0x26   :  { %p1630_p2 = scmp.ne.s32.totalorder %s1861_s3, %s1629_s30  ;;  %p1633_p3 = scmp.lt.u32.totalorder %s1629_s30, %s1861_s3 }
  0x28   :  { %p1635_p4 = pnand %p1633_p3, %p1630_p2 }
  0x2a   :  { %1638 = shalt.err (!%p1635_p4)
}
  0x2b   :  { %s1639_s12 = scalar_lea.vmem %s46_s18, 2048  ;;  %p1644_p6 = scmp.lt.s32.totalorder %s46_s18, %s46_s18 }
  0x2c   :  { %p1640_p5 = scmp.ne.s32.totalorder %s46_s18, %s1639_s12  ;;  %p1645_p7 = scmp.lt.s32.totalorder %s1639_s12, %s1639_s12 }
  0x2e   :  { %p1646_p8 = por %p1645_p7, %p1644_p6 }
  0x30   :  { %p1647_p9 = pnand %p1646_p8, %p1640_p5 }
  0x32   :  { %1650 = shalt.err (!%p1647_p9)
}
  0x33   :  { %s1708_s0 = smov 64   ;;  %s1709_s13 = smov 4  }
  0x34   :  { %51 = dma.hbm_to_vmem [thread:$0]  %s1861_s3, 2048, %s46_s18, [#allocation6], %s1708_s0, %s1708_s0, %s1709_s13  }
  0x35   :  { %s1710_s16 = smov [#allocation8]   ;;  %s1651_s21 = scalar_lea.hbm %s1863_s5, 1024 }
  0x36   :  { %s59_s17 = sshll.u32 %s1710_s16, 4  ;;  %p1652_p10 = scmp.ne.s32.totalorder %s1863_s5, %s1651_s21  ;;  %s60_s17 = int_to_ptr.vmem [resolvable:$true] %s59_s17 }
  0x37   :  { %p1655_p11 = scmp.lt.u32.totalorder %s1651_s21, %s1863_s5 }
  0x39   :  { %p1657_p12 = pnand %p1655_p11, %p1652_p10 }
  0x3b   :  { %1660 = shalt.err (!%p1657_p12)
}
  0x3c   :  { %s1661_s1 = scalar_lea.vmem %s60_s17, 1024  ;;  %p1666_p0 = scmp.lt.s32.totalorder %s60_s17, %s60_s17 }
  0x3d   :  { %p1662_p13 = scmp.ne.s32.totalorder %s60_s17, %s1661_s1  ;;  %p1667_p1 = scmp.lt.s32.totalorder %s1661_s1, %s1661_s1 }
  0x3f   :  { %p1668_p2 = por %p1667_p1, %p1666_p0 }
  0x41   :  { %p1669_p3 = pnand %p1668_p2, %p1662_p13 }
  0x43   :  { %1672 = shalt.err (!%p1669_p3)
}
  0x44   :  { %65 = dma.hbm_to_vmem [thread:$0]  %s1863_s5, 1024, %s60_s17, [#allocation9], %s1708_s0, %s1708_s0, %s1709_s13  }
  0x45   :  { %1695 = dma.done.wait [#allocation3], 224  }
  0x46   :  { %1696 = vsyncadd [#allocation3], 4294967072 }
  0x47   :  { %1697 = dma.done.wait [#allocation6], 14592  }
  0x48   :  { %1698 = vsyncadd [#allocation6], 4294952704 }
  0x49   :  { %1699 = dma.done.wait [#allocation9], 1024  }
  0x4a   :  { %1700 = vsyncadd [#allocation9], 4294966272  ;;  %v1412_v0 = vld [vmem:[#allocation5 + $0x104] ss:$8 sps:$4 sm:$0xff]   ;;  %v1414_v1 = vld [vmem:[#allocation5 + $0x100] ss:$8 sps:$4 sm:$0xff]   ;;  %v89_v11 = vlaneseq }
  0x4b   :  { %777 = vmatprep.subr.bf16.mxu0 %v1412_v0  ;;  %v1415_v2 = vld [vmem:[#allocation5 + $0x114] ss:$8 sps:$4 sm:$0xff]   ;;  %v1417_v3 = vld [vmem:[#allocation5 + $0x110] ss:$8 sps:$4 sm:$0xff]   ;;  %v1418_v4 = vld [vmem:[#allocation5 + $0x124] ss:$8 sps:$4 sm:$0xff]  }
  0x4c   :  { %778 = vmatpush1.bf16.msra.mxu0 %v1414_v1  ;;  %v1420_v5 = vld [vmem:[#allocation5 + $0x120] ss:$8 sps:$4 sm:$0xff]   ;;  %v1421_v6 = vld [vmem:[#allocation5 + $0x134] ss:$8 sps:$4 sm:$0xff]   ;;  %v1423_v7 = vld [vmem:[#allocation5 + $0x130] ss:$8 sps:$4 sm:$0xff]  }
  0x4d   :  { %779 = vmatprep.subr.bf16.mxu0 %v1415_v2  ;;  %v1424_v8 = vld [vmem:[#allocation5 + $0x144] ss:$8 sps:$4 sm:$0xff]   ;;  %v1711_v9 = vmov 1983009808   ;;  %v1426_v12 = vld [vmem:[#allocation5 + $0x140] ss:$8 sps:$4 sm:$0xff]  }
  0x4e   :  { %v87_v10 = vunpack.c.l.s4 %v1711_v9  ;;  %v1427_v13 = vld [vmem:[#allocation5 + $0x154] ss:$8 sps:$4 sm:$0xff]   ;;  %v1804_v15 = vshrl.u32 %v89_v11, 7  ;;  %v1429_v16 = vld [vmem:[#allocation5 + $0x150] ss:$8 sps:$4 sm:$0xff]   ;;  %vm732_vm0 = vcmask 130048  }
  0x4f   :  { %v1430_v17 = vld [vmem:[#allocation5 + $0x164] ss:$8 sps:$4 sm:$0xff]   ;;  %v81_v19 = vld [vmem:[#allocation2] sm:$0xff]  ;;  %v1432_v22 = vld [vmem:[#allocation5 + $0x160] ss:$8 sps:$4 sm:$0xff]   ;;  %vm1714_vm1 = vmmov 0  }
  0x50   :  { %780 = vmatpush1.bf16.msra.mxu0 %v1417_v3  ;;  %v88_v14 = vunpack.c.0.s8 %v87_v10  ;;  %v85_v20 = vcombine.high %v81_v19, %v81_v19  ;;  %v1433_v23 = vld [vmem:[#allocation5 + $0x174] ss:$8 sps:$4 sm:$0xff]   ;;  %v1467_v26 = vld [vmem:[#allocation5 + $0x4] ss:$8 sps:$4 sm:$0xff]   ;;  %v1435_v27 = vld [vmem:[#allocation5 + $0x170] ss:$8 sps:$4 sm:$0xff]  }
  0x51   :  { %781 = vmatprep.subr.bf16.mxu0 %v1418_v4  ;;  %v1472_v29 = vld [vmem:[#allocation5] ss:$8 sps:$4 sm:$0xff]   ;;  %736 = vmatprep.subr.bf16.mxu1 %v1467_v26  ;;  %v1473_v31 = vld [vmem:[#allocation5 + $0x14] ss:$8 sps:$4 sm:$0xff]   ;;  %v1436_v32 = vld [vmem:[#allocation5 + $0x184] ss:$8 sps:$4 sm:$0xff]  }
  0x52   :  { %v1807_v18 = vsub.s32 %v88_v14, %v1804_v15  ;;  %737 = vmatpush1.bf16.msra.mxu1 %v1472_v29  ;;  %v1478_v34 = vld [vmem:[#allocation5 + $0x10] ss:$8 sps:$4 sm:$0xff]   ;;  %v1479_v35 = vld [vmem:[#allocation5 + $0x24] ss:$8 sps:$4 sm:$0xff]   ;;  %v1438_v36 = vld [vmem:[#allocation5 + $0x180] ss:$8 sps:$4 sm:$0xff]  }
  0x53   :  { %738 = vmatprep.subr.bf16.mxu1 %v1473_v31  ;;  %v1439_v37 = vld [vmem:[#allocation5 + $0x194] ss:$8 sps:$4 sm:$0xff]   ;;  %v1484_v38 = vld [vmem:[#allocation5 + $0x20] ss:$8 sps:$4 sm:$0xff]   ;;  %v1441_v40 = vld [vmem:[#allocation5 + $0x190] ss:$8 sps:$4 sm:$0xff]  }
  0x54   :  { %782 = vmatpush1.bf16.msra.mxu0 %v1420_v5  ;;  %v1810_v21 = vrot.slane %v81_v19, %v1807_v18  ;;  %v1813_v24 = vrot.slane %v85_v20, %v1807_v18  ;;  %v1485_v39 = vld [vmem:[#allocation5 + $0x34] ss:$8 sps:$4 sm:$0xff]   ;;  %v1442_v41 = vld [vmem:[#allocation5 + $0x1a4] ss:$8 sps:$4 sm:$0xff]   ;;  %v1490_v42 = vld [vmem:[#allocation5 + $0x30] ss:$8 sps:$4 sm:$0xff]  }
  0x55   :  { %783 = vmatprep.subr.bf16.mxu0 %v1421_v6  ;;  %v1491_v43 = vld [vmem:[#allocation5 + $0x44] ss:$8 sps:$4 sm:$0xff]   ;;  %v1444_v44 = vld [vmem:[#allocation5 + $0x1a0] ss:$8 sps:$4 sm:$0xff]   ;;  %v1445_v45 = vld [vmem:[#allocation5 + $0x1b4] ss:$8 sps:$4 sm:$0xff]  }
  0x56   :  { %v100_v25 = vcombine.high %v1810_v21, %v1810_v21  ;;  %v101_v28 = vcombine.high %v1813_v24, %v1813_v24  ;;  %739 = vmatpush1.bf16.msra.mxu1 %v1478_v34  ;;  %v1496_v46 = vld [vmem:[#allocation5 + $0x40] ss:$8 sps:$4 sm:$0xff]   ;;  %v1497_v47 = vld [vmem:[#allocation5 + $0x54] ss:$8 sps:$4 sm:$0xff]   ;;  %v1447_v48 = vld [vmem:[#allocation5 + $0x1b0] ss:$8 sps:$4 sm:$0xff]   ;;  %v127_v5 = vpack.c.bf16 %v1813_v24, %v1813_v24 }
  0x57   :  { %740 = vmatprep.subr.bf16.mxu1 %v1479_v35  ;;  %v1448_v49 = vld [vmem:[#allocation5 + $0x1c4] ss:$8 sps:$4 sm:$0xff]   ;;  %v1502_v50 = vld [vmem:[#allocation5 + $0x50] ss:$8 sps:$4 sm:$0xff]   ;;  %v1450_v52 = vld [vmem:[#allocation5 + $0x1c0] ss:$8 sps:$4 sm:$0xff]  }
  0x58   :  { %784 = vmatpush1.bf16.msra.mxu0 %v1423_v7  ;;  %v126_v30 = vpack.c.bf16 %v100_v25, %v100_v25  ;;  %v128_v33 = vpack.c.bf16 %v101_v28, %v101_v28  ;;  %v1503_v51 = vld [vmem:[#allocation5 + $0x64] ss:$8 sps:$4 sm:$0xff]   ;;  %v1451_v53 = vld [vmem:[#allocation5 + $0x1d4] ss:$8 sps:$4 sm:$0xff]   ;;  %v1508_v54 = vld [vmem:[#allocation5 + $0x60] ss:$8 sps:$4 sm:$0xff]  }
  0x59   :  { %785 = vmatprep.subr.bf16.mxu0 %v1424_v8  ;;  %v1509_v55 = vld [vmem:[#allocation5 + $0x74] ss:$8 sps:$4 sm:$0xff]   ;;  %v1453_v56 = vld [vmem:[#allocation5 + $0x1d0] ss:$8 sps:$4 sm:$0xff]   ;;  %v1454_v57 = vld [vmem:[#allocation5 + $0x1e4] ss:$8 sps:$4 sm:$0xff]  }
  0x5a   :  { %768 = vmatprep.mubr.bf16.mxu1 %v126_v30  ;;  %809 = vmatprep.mubr.bf16.mxu0 %v128_v33  ;;  %v1514_v58 = vld [vmem:[#allocation5 + $0x70] ss:$8 sps:$4 sm:$0xff]   ;;  %v1515_v59 = vld [vmem:[#allocation5 + $0x84] ss:$8 sps:$4 sm:$0xff]   ;;  %v1456_v60 = vld [vmem:[#allocation5 + $0x1e0] ss:$8 sps:$4 sm:$0xff]  }
  0x5b   :  { %741 = vmatpush1.bf16.msra.mxu1 %v1484_v38  ;;  %v1457_v61 = vld [vmem:[#allocation5 + $0x1f4] ss:$8 sps:$4 sm:$0xff]   ;;  %v1520_v62 = vld [vmem:[#allocation5 + $0x80] ss:$8 sps:$4 sm:$0xff]   ;;  %v1459_v0 = vld [vmem:[#allocation5 + $0x1f0] ss:$8 sps:$4 sm:$0xff]   ;;  %v125_v38 = vpack.c.bf16 %v1810_v21, %v1810_v21 }
  0x5c   :  { %786 = vmatpush1.bf16.msra.mxu0 %v1426_v12  ;;  %742 = vmatprep.subr.bf16.mxu1 %v1485_v39  ;;  %v1521_v63 = vld [vmem:[#allocation5 + $0x94] ss:$8 sps:$4 sm:$0xff]   ;;  %v1463_v1 = vld [vmem:[#allocation5 + $0x204] ss:$8 sps:$4 sm:$0xff]   ;;  %v1526_v2 = vld [vmem:[#allocation5 + $0x90] ss:$8 sps:$4 sm:$0xff]  }
  0x5d   :  { %787 = vmatprep.subr.bf16.mxu0 %v1427_v13  ;;  %v1527_v3 = vld [vmem:[#allocation5 + $0xa4] ss:$8 sps:$4 sm:$0xff]   ;;  %v82_v4 = vld [vmem:[#allocation2 + $0x8] sm:$0x3f]  ;;  %v1461_v8 = vld [vmem:[#allocation5 + $0x200] ss:$8 sps:$4 sm:$0xff]  }
  0x5e   :  { %v102_v6 = vcombine.high %v82_v4, %v82_v4  ;;  %v1822_v7 = vrot.slane %v82_v4, %v1807_v18  ;;  %v1466_v9 = vld [vmem:[#allocation5 + $0x214] ss:$8 sps:$4 sm:$0xff]   ;;  %v1532_v10 = vld [vmem:[#allocation5 + $0xa0] ss:$8 sps:$4 sm:$0xff]   ;;  %v1464_v14 = vld [vmem:[#allocation5 + $0x210] ss:$8 sps:$4 sm:$0xff]  }
  0x5f   :  { %743 = vmatpush1.bf16.msra.mxu1 %v1490_v42  ;;  %v1533_v13 = vld [vmem:[#allocation5 + $0xb4] ss:$8 sps:$4 sm:$0xff]   ;;  %v1538_v19 = vld [vmem:[#allocation5 + $0xb0] ss:$8 sps:$4 sm:$0xff]   ;;  %v1539_v20 = vld [vmem:[#allocation5 + $0xc4] ss:$8 sps:$4 sm:$0xff]  }
  0x60   :  { %788 = vmatpush1.bf16.msra.mxu0 %v1429_v16  ;;  %744 = vmatprep.subr.bf16.mxu1 %v1491_v43  ;;  %v1825_v11 = vrot.slane %v102_v6, %v1807_v18  ;;  %v117_v12 = vcombine.high %v1822_v7, %v1822_v7  ;;  %v1477_v18 = vld [vmem:[#allocation5 + $0x234] ss:$8 sps:$4 sm:$0xff]   ;;  %v1475_v24 = vld [vmem:[#allocation5 + $0x230] ss:$8 sps:$4 sm:$0xff]   ;;  %v1483_v26 = vld [vmem:[#allocation5 + $0x244] ss:$8 sps:$4 sm:$0xff]  }
  0x61   :  { %789 = vmatprep.subr.bf16.mxu0 %v1430_v17  ;;  %v1471_v17 = vld [vmem:[#allocation5 + $0x224] ss:$8 sps:$4 sm:$0xff]   ;;  %v1545_v25 = vld [vmem:[#allocation5 + $0xd4] ss:$8 sps:$4 sm:$0xff]   ;;  %v1481_v29 = vld [vmem:[#allocation5 + $0x240] ss:$8 sps:$4 sm:$0xff]  }
  0x62   :  { %v130_v16 = vpack.c.bf16 %v117_v12, %v117_v12  ;;  %v1552_v28 = vld [vmem:[#allocation5 + $0xe4] ss:$8 sps:$4 sm:$0xff]   ;;  %v1489_v30 = vld [vmem:[#allocation5 + $0x254] ss:$8 sps:$4 sm:$0xff]   ;;  %v1557_v31 = vld [vmem:[#allocation5 + $0xe0] ss:$8 sps:$4 sm:$0xff]  }
  0x63   :  { %745 = vmatpush1.bf16.msra.mxu1 %v1496_v46  ;;  %v1487_v33 = vld [vmem:[#allocation5 + $0x250] ss:$8 sps:$4 sm:$0xff]   ;;  %v1495_v34 = vld [vmem:[#allocation5 + $0x264] ss:$8 sps:$4 sm:$0xff]   ;;  %v1501_v39 = vld [vmem:[#allocation5 + $0x274] ss:$8 sps:$4 sm:$0xff]  }
  0x64   :  { %790 = vmatpush1.bf16.msra.mxu0 %v1432_v22  ;;  %746 = vmatprep.subr.bf16.mxu1 %v1497_v47  ;;  %v1469_v22 = vld [vmem:[#allocation5 + $0x220] ss:$8 sps:$4 sm:$0xff]   ;;  %v1560_v35 = vld [vmem:[#allocation5 + $0xf0] ss:$8 sps:$4 sm:$0xff]   ;;  %v1507_v43 = vld [vmem:[#allocation5 + $0x284] ss:$8 sps:$4 sm:$0xff]  }
  0x65   :  { %791 = vmatprep.subr.bf16.mxu0 %v1433_v23  ;;  %v1544_v23 = vld [vmem:[#allocation5 + $0xc0] ss:$8 sps:$4 sm:$0xff]   ;;  %v1499_v42 = vld [vmem:[#allocation5 + $0x270] ss:$8 sps:$4 sm:$0xff]   ;;  %v1513_v47 = vld [vmem:[#allocation5 + $0x294] ss:$8 sps:$4 sm:$0xff]  }
  0x66   :  { %v1505_v46 = vld [vmem:[#allocation5 + $0x280] ss:$8 sps:$4 sm:$0xff]   ;;  %v1712_v4 = vmov 0   ;;  %v1571_v6 = vld [vmem:[#allocation7 + $0x68] sm:$0xff]   ;;  %s1715_s30 = smov [#allocation10]   ;;  %vm1192_vm2 = vcmask 74752  }
  0x67   :  { %747 = vmatpush1.bf16.msra.mxu1 %v1502_v50  ;;  %v1566_v21 = vld [vmem:[#allocation7 + $0x10] sm:$0xff]   ;;  %v1576_v12 = vld [vmem:[#allocation7 + $0x38] sm:$0xff]   ;;  %s1200_s8 = sshll.u32 %s1715_s30, 4  ;;  %s1201_s8 = int_to_ptr.vmem [resolvable:$true] %s1200_s8 }
  0x68   :  { %792 = vmatpush1.bf16.msra.mxu0 %v1435_v27  ;;  %748 = vmatprep.subr.bf16.mxu1 %v1503_v51  ;;  %v1550_v27 = vld [vmem:[#allocation5 + $0xd0] ss:$8 sps:$4 sm:$0xff]   ;;  %v1519_v50 = vld [vmem:[#allocation5 + $0x2a4] ss:$8 sps:$4 sm:$0xff]   ;;  %p1678_p5 = scmp.lt.s32.totalorder %s1201_s8, %s1201_s8 }
  0x69   :  { %793 = vmatprep.subr.bf16.mxu0 %v1436_v32  ;;  %v1558_v32 = vld [vmem:[#allocation5 + $0xf4] ss:$8 sps:$4 sm:$0xff]   ;;  %v1568_v51 = vld [vmem:[#allocation7 + $0x18] sm:$0xff]  }
  0x6b   :  { %749 = vmatpush1.bf16.msra.mxu1 %v1508_v54  ;;  %v1525_v54 = vld [vmem:[#allocation5 + $0x2b4] ss:$8 sps:$4 sm:$0xff]  }
  0x6c   :  { %794 = vmatpush1.bf16.msra.mxu0 %v1438_v36  ;;  %750 = vmatprep.subr.bf16.mxu1 %v1509_v55  ;;  %v1561_v36 = vld [vmem:[#allocation7 + $0x40] sm:$0xff]  }
  0x6d   :  { %795 = vmatprep.subr.bf16.mxu0 %v1439_v37  ;;  %v1493_v37 = vld [vmem:[#allocation5 + $0x260] ss:$8 sps:$4 sm:$0xff]   ;;  %v1570_v55 = vld [vmem:[#allocation7 + $0x20] sm:$0xff]  }
  0x6f   :  { %751 = vmatpush1.bf16.msra.mxu1 %v1514_v58  ;;  %v1529_v58 = vld [vmem:[#allocation5 + $0x2c0] ss:$8 sps:$4 sm:$0xff]  }
  0x70   :  { %796 = vmatpush1.bf16.msra.mxu0 %v1441_v40  ;;  %752 = vmatprep.subr.bf16.mxu1 %v1515_v59  ;;  %v1562_v40 = vld [vmem:[#allocation7] sm:$0xff]  }
  0x71   :  { %797 = vmatprep.subr.bf16.mxu0 %v1442_v41  ;;  %v1563_v41 = vld [vmem:[#allocation7 + $0x48] sm:$0xff]  }
  0x72   :  { %v1537_v59 = vld [vmem:[#allocation5 + $0x2d4] ss:$8 sps:$4 sm:$0xff]  }
  0x73   :  { %753 = vmatpush1.bf16.msra.mxu1 %v1520_v62  ;;  %v1541_v62 = vld [vmem:[#allocation5 + $0x2e0] ss:$8 sps:$4 sm:$0xff]  }
  0x74   :  { %798 = vmatpush1.bf16.msra.mxu0 %v1444_v44  ;;  %754 = vmatprep.subr.bf16.mxu1 %v1521_v63  ;;  %v1564_v44 = vld [vmem:[#allocation7 + $0x8] sm:$0xff]  }
  0x75   :  { %799 = vmatprep.subr.bf16.mxu0 %v1445_v45  ;;  %v1565_v45 = vld [vmem:[#allocation7 + $0x50] sm:$0xff]   ;;  %v1549_v63 = vld [vmem:[#allocation5 + $0x2f4] ss:$8 sps:$4 sm:$0xff]  }
  0x77   :  { %755 = vmatpush1.bf16.msra.mxu1 %v1526_v2  ;;  %v129_v2 = vpack.c.bf16 %v1822_v7, %v1822_v7  ;;  %v1575_v7 = vld [vmem:[#allocation7 + $0x78] sm:$0xff]  }
  0x78   :  { %800 = vmatpush1.bf16.msra.mxu0 %v1447_v48  ;;  %756 = vmatprep.subr.bf16.mxu1 %v1527_v3  ;;  %v1567_v48 = vld [vmem:[#allocation7 + $0x58] sm:$0xff]  }
  0x79   :  { %801 = vmatprep.subr.bf16.mxu0 %v1448_v49  ;;  %v1511_v49 = vld [vmem:[#allocation5 + $0x290] ss:$8 sps:$4 sm:$0xff]   ;;  %v1554_v3 = vld [vmem:[#allocation5 + $0x300] ss:$8 sps:$4 sm:$0xff]  }
  0x7b   :  { %757 = vmatpush1.bf16.msra.mxu1 %v1532_v10  ;;  %v1574_v10 = vld [vmem:[#allocation7 + $0x30] sm:$0xff]  }
  0x7c   :  { %802 = vmatpush1.bf16.msra.mxu0 %v1450_v52  ;;  %758 = vmatprep.subr.bf16.mxu1 %v1533_v13  ;;  %v1569_v52 = vld [vmem:[#allocation7 + $0x60] sm:$0xff]   ;;  %v1713_v13 = vmov 0.0  }
  0x7d   :  { %803 = vmatprep.subr.bf16.mxu0 %v1451_v53  ;;  %v1517_v53 = vld [vmem:[#allocation5 + $0x2a0] ss:$8 sps:$4 sm:$0xff]  }
  0x7f   :  { %759 = vmatpush1.bf16.msra.mxu1 %v1538_v19  ;;  %v234_v19 = vsub.s32 0, %v1804_v15 }
  0x80   :  { %804 = vmatpush1.bf16.msra.mxu0 %v1453_v56  ;;  %760 = vmatprep.subr.bf16.mxu1 %v1539_v20  ;;  %v1523_v56 = vld [vmem:[#allocation5 + $0x2b0] ss:$8 sps:$4 sm:$0xff]  }
  0x81   :  { %805 = vmatprep.subr.bf16.mxu0 %v1454_v57  ;;  %v1531_v57 = vld [vmem:[#allocation5 + $0x2c4] ss:$8 sps:$4 sm:$0xff]   ;;  %v230_v20 = vld [vmem:[%s1860_s2] sm:$0x3] }
  0x83   :  { %761 = vmatpush1.bf16.msra.mxu1 %v1544_v23 }
  0x84   :  { %806 = vmatpush1.bf16.msra.mxu0 %v1456_v60  ;;  %762 = vmatprep.subr.bf16.mxu1 %v1545_v25  ;;  %v1535_v60 = vld [vmem:[#allocation5 + $0x2d0] ss:$8 sps:$4 sm:$0xff]  }
  0x85   :  { %807 = vmatprep.subr.bf16.mxu0 %v1457_v61  ;;  %v1543_v61 = vld [vmem:[#allocation5 + $0x2e4] ss:$8 sps:$4 sm:$0xff]  }
  0x87   :  { %763 = vmatpush1.bf16.msra.mxu1 %v1550_v27 }
  0x88   :  { %808 = vmatpush1.bf16.msra.mxu0 %v1459_v0  ;;  %764 = vmatprep.subr.bf16.mxu1 %v1552_v28  ;;  %v1547_v0 = vld [vmem:[#allocation5 + $0x2f0] ss:$8 sps:$4 sm:$0xff]  }
  0x89   :  { %818 = vmatprep.subr.bf16.mxu0 %v1463_v1  ;;  %v1556_v1 = vld [vmem:[#allocation5 + $0x304] ss:$8 sps:$4 sm:$0xff]  }
  0x8b   :  { %810 = vmatmul.mubr.bf16.vlgmr.msra.gmra.mrb[0].mxu0 %v127_v5  ;;  %765 = vmatpush1.bf16.msra.mxu1 %v1557_v31  ;;  %v131_v5 = vpack.c.bf16 %v1825_v11, %v1825_v11 }
  0x8c   :  { %819 = vmatpush1.bf16.msra.mxu0 %v1461_v8  ;;  %850 = vmatprep.mubr.bf16.mxu0 %v130_v16  ;;  %v1572_v8 = vld [vmem:[#allocation7 + $0x28] sm:$0xff]  }
  0x8d   :  { %820 = vmatprep.subr.bf16.mxu0 %v1466_v9  ;;  %766 = vmatprep.subr.bf16.mxu1 %v1558_v32  ;;  %v1573_v9 = vld [vmem:[#allocation7 + $0x70] sm:$0xff]  }
  0x8f   :  { %767 = vmatpush1.bf16.msra.mxu1 %v1560_v35  ;;  %v1577_v35 = vld [vmem:[#allocation8] sm:$0xff]  }
  0x90   :  { %821 = vmatpush1.bf16.msra.mxu0 %v1464_v14  ;;  %1336 = vmatprep.subr.bf16.mxu1 %v1561_v36 }
  0x91   :  { %822 = vmatprep.subr.bf16.mxu0 %v1471_v17 }
  0x92   :  { %769 = vmatmul.mubr.bf16.vlgmr.msra.gmra.mrb[0].mxu1 %v125_v38  ;;  %v1580_v38 = vld [vmem:[#allocation8 + $0x18] sm:$0xff]  }
  0x93   :  { %1337 = vmatpush3.bf16.msra.mxu1 %v1562_v40  ;;  %v1582_v40 = vld [vmem:[#allocation8 + $0x28] sm:$0xff]  }
  0x94   :  { %823 = vmatpush1.bf16.msra.mxu0 %v1469_v22  ;;  %1338 = vmatprep.subr.bf16.mxu1 %v1563_v41  ;;  %v238_v22 = vsub.s32 1, %v1804_v15  ;;  %v1579_v15 = vld [vmem:[#allocation8 + $0x10] sm:$0xff]  }
  0x95   :  { %824 = vmatprep.subr.bf16.mxu0 %v1477_v18  ;;  %v235_v18 = vrot.slane %v230_v20, %v234_v19  ;;  %v1583_v41 = vld [vmem:[#allocation8 + $0x30] sm:$0xff]  }
  0x96   :  { %v239_v23 = vrot.slane %v230_v20, %v238_v22 }
  0x97   :  { %1339 = vmatpush3.bf16.msra.mxu1 %v1564_v44  ;;  %v1310_v44 = vld [vmem:[%s1862_s4] ss:$0 sm:$0xff]  ;;  %s1673_s4 = scalar_lea.vmem %s1201_s8, 32 }
  0x98   :  { %825 = vmatpush1.bf16.msra.mxu0 %v1475_v24  ;;  %1340 = vmatprep.subr.bf16.mxu1 %v1565_v45  ;;  %p1674_p4 = scmp.ne.s32.totalorder %s1201_s8, %s1673_s4  ;;  %p1679_p6 = scmp.lt.s32.totalorder %s1673_s4, %s1673_s4 }
  0x99   :  { %826 = vmatprep.subr.bf16.mxu0 %v1483_v26 }
  0x9a   :  { %p1680_p7 = por %p1679_p6, %p1678_p5 }
  0x9b   :  { %1341 = vmatpush3.bf16.msra.mxu1 %v1566_v21 }
  0x9c   :  { %827 = vmatpush1.bf16.msra.mxu0 %v1481_v29  ;;  %1342 = vmatprep.subr.bf16.mxu1 %v1567_v48  ;;  %p1681_p8 = pnand %p1680_p7, %p1674_p4 }
  0x9d   :  { %828 = vmatprep.subr.bf16.mxu0 %v1489_v30 }
  0x9f   :  { %1343 = vmatpush3.bf16.msra.mxu1 %v1568_v51  ;;  %v1327_v51 = vld [vmem:[%s1864_s6] ss:$0 sm:$0xff] }
  0xa0   :  { %829 = vmatpush1.bf16.msra.mxu0 %v1487_v33  ;;  %1344 = vmatprep.subr.bf16.mxu1 %v1569_v52 }
  0xa1   :  { %830 = vmatprep.subr.bf16.mxu0 %v1495_v34 }
  0xa3   :  { %1345 = vmatpush3.bf16.msra.mxu1 %v1570_v55 }
  0xa4   :  { %831 = vmatpush1.bf16.msra.mxu0 %v1493_v37  ;;  %1346 = vmatprep.subr.bf16.mxu1 %v1571_v6  ;;  %v1578_v37 = vld [vmem:[#allocation8 + $0x8] sm:$0xff]  }
  0xa5   :  { %832 = vmatprep.subr.bf16.mxu0 %v1501_v39  ;;  %v1581_v39 = vld [vmem:[#allocation8 + $0x20] sm:$0xff]  }
  0xa7   :  { %1347 = vmatpush3.bf16.msra.mxu1 %v1572_v8 }
  0xa8   :  { %833 = vmatpush1.bf16.msra.mxu0 %v1499_v42  ;;  %1348 = vmatprep.subr.bf16.mxu1 %v1573_v9  ;;  %v1584_v42 = vld [vmem:[#allocation8 + $0x38] sm:$0xff]  }
  0xa9   :  { %834 = vmatprep.subr.bf16.mxu0 %v1507_v43 }
  0xab   :  { %1349 = vmatpush3.bf16.msra.mxu1 %v1574_v10 }
  0xac   :  { %835 = vmatpush1.bf16.msra.mxu0 %v1505_v46  ;;  %1350 = vmatprep.subr.bf16.mxu1 %v1575_v7 }
  0xad   :  { %836 = vmatprep.subr.bf16.mxu0 %v1513_v47 }
  0xaf   :  { %1351 = vmatpush3.bf16.msra.mxu1 %v1576_v12 }
  0xb0   :  { %837 = vmatpush1.bf16.msra.mxu0 %v1511_v49  ;;  %1367 = vmatprep.subr.bf16.mxu1 %v1713_v13 }
  0xb1   :  { %838 = vmatprep.subr.bf16.mxu0 %v1519_v50 }
  0xb4   :  { %839 = vmatpush1.bf16.msra.mxu0 %v1517_v53 }
  0xb5   :  { %840 = vmatprep.subr.bf16.mxu0 %v1525_v54 }
  0xb8   :  { %841 = vmatpush1.bf16.msra.mxu0 %v1523_v56 }
  0xb9   :  { %842 = vmatprep.subr.bf16.mxu0 %v1531_v57 }
  0xbc   :  { %843 = vmatpush1.bf16.msra.mxu0 %v1529_v58 }
  0xbd   :  { %844 = vmatprep.subr.bf16.mxu0 %v1537_v59 }
  0xc0   :  { %845 = vmatpush1.bf16.msra.mxu0 %v1535_v60 }
  0xc1   :  { %846 = vmatprep.subr.bf16.mxu0 %v1543_v61 }
  0xc4   :  { %847 = vmatpush1.bf16.msra.mxu0 %v1541_v62 }
  0xc5   :  { %848 = vmatprep.subr.bf16.mxu0 %v1549_v63 }
  0xc8   :  { %849 = vmatpush1.bf16.msra.mxu0 %v1547_v0 }
  0xc9   :  { %859 = vmatprep.subr.bf16.mxu0 %v1556_v1 }
  0xcb   :  { %851 = vmatmul.mubr.bf16.vlgmr.msra.gmra.mrb[0].mxu0 %v129_v2 }
  0xcc   :  { %860 = vmatpush1.bf16.msra.mxu0 %v1554_v3  ;;  %891 = vmatprep.mubr.bf16.mxu0 %v1712_v4 }
  0xd7   :  { %1309 = vmatmul.mubr.msk.bf16.vlgmr.msra.gmra.mrb[0].mxu0 %vm732_vm0, %v131_v5 }
 0x165   :  { %v770_v14 = vpop.f32.mrb[0].mxu1 }
 0x166   :  { %v772_v16 = vpop.f32.mrb[1].mxu1  ;;  %v771_v24 = vadd.f32 %v770_v14, %v235_v18 }
 0x167   :  { %v774_v17 = vpop.f32.mrb[2].mxu1  ;;  %v773_v25 = vadd.f32 %v772_v16, %v239_v23 }
 0x168   :  { %v775_v11 = vpop.f32.mrb[3].mxu1 }
 0x1aa   :  { %v893_v26 = vpop.f32.mrb[0].mxu0 }
 0x1ab   :  { %v1388_v27 = vadd.f32 %v893_v26, %v771_v24  ;;  %v895_v28 = vpop.f32.mrb[1].mxu0 }
 0x1ac   :  { %v1390_v29 = vadd.f32 %v895_v28, %v773_v25  ;;  %v897_v30 = vpop.f32.mrb[2].mxu0 }
 0x1ad   :  { %v900_v31 = vmax.f32 %v1388_v27, 0.0  ;;  %v898_v32 = vpop.f32.mrb[3].mxu0 }
 0x1ae   :  { %v901_v33 = vmax.f32 %v1390_v29, 0.0 }
 0x1af   :  { %v902_v36 = vpack.c.bf16 %v900_v31, %v900_v31 }
 0x1b0   :  { %v903_v34 = vpack.c.bf16 %v901_v33, %v901_v33 }
 0x1b2   :  { %1071 = vmatprep.mubr.bf16.mxu1 %v903_v34 }
 0x1b3   :  { %1072 = vmatmul.mubr.bf16.vlgmr.msra.gmra.mrb[4].mxu1 %v902_v36 }
 0x1b4   :  { %1368 = vmatpush3.bf16.msra.mxu1 %v1577_v35  ;;  %1383 = vmatprep.mubr.msk.bf16.mxu1 %vm1714_vm1, %v1713_v13 }
 0x1b5   :  { %1369 = vmatprep.subr.bf16.mxu1 %v1713_v13 }
 0x1b8   :  { %1370 = vmatpush3.bf16.msra.mxu1 %v1578_v37 }
 0x1b9   :  { %1371 = vmatprep.subr.bf16.mxu1 %v1713_v13 }
 0x1bc   :  { %1372 = vmatpush3.bf16.msra.mxu1 %v1579_v15 }
 0x1bd   :  { %1373 = vmatprep.subr.bf16.mxu1 %v1713_v13 }
 0x1c0   :  { %1374 = vmatpush3.bf16.msra.mxu1 %v1580_v38 }
 0x1c1   :  { %1375 = vmatprep.subr.bf16.mxu1 %v1713_v13 }
 0x1c4   :  { %1376 = vmatpush3.bf16.msra.mxu1 %v1581_v39 }
 0x1c5   :  { %1377 = vmatprep.subr.bf16.mxu1 %v1713_v13 }
 0x1c8   :  { %1378 = vmatpush3.bf16.msra.mxu1 %v1582_v40 }
 0x1c9   :  { %1379 = vmatprep.subr.bf16.mxu1 %v1713_v13 }
 0x1cc   :  { %1380 = vmatpush3.bf16.msra.mxu1 %v1583_v41 }
 0x1cd   :  { %1381 = vmatprep.subr.bf16.mxu1 %v1713_v13 }
 0x1d0   :  { %1382 = vmatpush3.bf16.msra.mxu1 %v1584_v42 }
 0x286   :  { %v1352_v43 = vpop.f32.mrb[4].mxu1 }
 0x287   :  { %v1353_v45 = vpop.f32.mrb[5].mxu1 }
 0x288   :  { %v1354_v46 = vadd.f32 %v1353_v45, %v1352_v43  ;;  %v1355_v47 = vpop.f32.mrb[6].mxu1 }
 0x289   :  { %v1356_v21 = vpop.f32.mrb[7].mxu1 }
 0x28a   :  { %v1074_v48 = vadd.f32 %v1354_v46, %v1310_v44 }
 0x28c   :  { %v1079_v49 = vmax.f32 %v1074_v48, 0.0 }
 0x28e   :  { %v1080_v50 = vpack.c.bf16 %v1079_v49, %v1079_v49 }
 0x290   :  { %1384 = vmatmul.mubr.bf16.vlgmr.msra.gmra.mrb[8].mxu1 %v1080_v50 }
 0x363   :  { %v1186_v52 = vpop.f32.mrb[8].mxu1 }
 0x364   :  { %v1187_v53 = vadd.f32 %v1327_v51, %v1186_v52  ;;  %v1385_v54 = vpop.f32.mrb[9].mxu1 }
 0x365   :  { %v1189_v55 = vpop.f32.mrb[10].mxu1 }
 0x366   :  { %v1386_v56 = vpop.f32.mrb[11].mxu1  ;;  %1193 = vst.msk [vmem:[#allocation10] sm:$0x3] %vm1192_vm2, %v1187_v53 }
 0x367   :  { %1684 = shalt.err (!%p1681_p8)
}
 0x368   :  { %s1685_s6 = scalar_lea.hbm %s1865_s7, 32 }
 0x369   :  { %p1686_p9 = scmp.ne.s32.totalorder %s1865_s7, %s1685_s6  ;;  %p1689_p10 = scmp.lt.u32.totalorder %s1685_s6, %s1865_s7 }
 0x36b   :  { %p1691_p11 = pnand %p1689_p10, %p1686_p9 }
 0x36d   :  { %1694 = shalt.err (!%p1691_p11)
}
 0x36e   :  { %1203 = dma.vmem_to_hbm [thread:$0]  %s1201_s8, 32, %s1865_s7, [#allocation4]  }
 0x36f   :  { %1701 = dma.done.wait [#allocation4], 32  }
 0x370   :  { %1702 = vsyncadd [#allocation4], 4294967264 }
 0x371   :  { %1207 = vsyncpa [#allocation3], 1 }
 0x372   :  { %1208 = vsyncpa [#allocation6], 1 }
 0x373   :  { %1209 = vsyncpa [#allocation9], 1 }
 0x374   :  { %1210 = vsyncpa [#allocation4], 1 }

// kernel: tpu_custom_call.1
= control target key start
LH: loop header
LB: loop body
LE: loop exit
PB: predicated region body
PF: predicated region fallthrough
CT: control target
= control target key end

     0   :  { %12 = vsyncpa [#allocation3], 0  ;;  %s1858_s0 = inlined_call_operand.hbm [shape: f32[2,784], index: 0, kind: input, shape index: {}]   ;;  %s1859_s1 = inlined_call_operand.hbm [shape: bf16[784,256], index: 1, kind: input, shape index: {}]   ;;  %s1860_s2 = inlined_call_operand.vmem [shape: f32[1,256], index: 2, kind: input, shape index: {}]   ;;  %s1861_s3 = inlined_call_operand.hbm [shape: bf16[256,128], index: 3, kind: input, shape index: {}]   ;;  %s1862_s4 = inlined_call_operand.vmem [shape: f32[1,128], index: 4, kind: input, shape index: {}]   ;;  %s1863_s5 = inlined_call_operand.hbm [shape: bf16[128,128], index: 5, kind: input, shape index: {}]   ;;  %s1864_s6 = inlined_call_operand.vmem [shape: f32[1,128], index: 6, kind: input, shape index: {}]   ;;  %s1865_s7 = inlined_call_operand.hbm [shape: f32[2,10], index: 7, kind: output, shape index: {}]  }
   0x1   :  { %13 = vsyncpa [#allocation6], 0 }
   0x2   :  { %14 = vsyncpa [#allocation9], 0 }
   0x3   :  { %15 = vsyncpa [#allocation4], 0  ;;  %s1703_s24 = smov [#allocation5]   ;;  %s1585_s28 = scalar_lea.hbm %s1859_s1, 12544 }
   0x4   :  { %s31_s25 = sshll.u32 %s1703_s24, 4  ;;  %p1586_p0 = scmp.ne.s32.totalorder %s1859_s1, %s1585_s28  ;;  %s32_s25 = int_to_ptr.vmem [resolvable:$true] %s31_s25 }
   0x5   :  { %p1589_p1 = scmp.lt.u32.totalorder %s1585_s28, %s1859_s1 }
   0x7   :  { %p1591_p2 = pnand %p1589_p1, %p1586_p0 }
   0x9   :  { %1594 = shalt.err (!%p1591_p2)
}
   0xa   :  { %s1595_s10 = scalar_lea.vmem %s32_s25, 12544  ;;  %p1600_p4 = scmp.lt.s32.totalorder %s32_s25, %s32_s25 }
   0xb   :  { %p1596_p3 = scmp.ne.s32.totalorder %s32_s25, %s1595_s10  ;;  %p1601_p5 = scmp.lt.s32.totalorder %s1595_s10, %s1595_s10 }
   0xd   :  { %p1602_p6 = por %p1601_p5, %p1600_p4 }
   0xf   :  { %p1603_p7 = pnand %p1602_p6, %p1596_p3 }
  0x11   :  { %1606 = shalt.err (!%p1603_p7)
}
  0x12   :  { %s1704_s11 = smov 128   ;;  %s1705_s12 = smov 8  }
  0x13   :  { %37 = dma.hbm_to_vmem [thread:$0]  %s1859_s1, 12544, %s32_s25, [#allocation6], %s1704_s11, %s1704_s11, %s1705_s12  }
  0x14   :  { %s1706_s15 = smov [#allocation2]   ;;  %s1707_s17 = smov [#allocation7]  }
  0x15   :  { %s22_s16 = sshll.u32 %s1706_s15, 4  ;;  %s45_s18 = sshll.u32 %s1707_s17, 4  ;;  %s23_s16 = int_to_ptr.vmem [resolvable:$true] %s22_s16  ;;  %s46_s18 = int_to_ptr.vmem [resolvable:$true] %s45_s18 }
  0x16   :  { %s1607_s21 = scalar_lea.hbm %s1858_s0, 224 }
  0x17   :  { %p1608_p8 = scmp.ne.s32.totalorder %s1858_s0, %s1607_s21  ;;  %p1611_p9 = scmp.lt.u32.totalorder %s1607_s21, %s1858_s0 }
  0x19   :  { %p1613_p10 = pnand %p1611_p9, %p1608_p8 }
  0x1b   :  { %1616 = shalt.err (!%p1613_p10)
}
  0x1c   :  { %s1617_s1 = scalar_lea.vmem %s23_s16, 224  ;;  %p1622_p12 = scmp.lt.s32.totalorder %s23_s16, %s23_s16 }
  0x1d   :  { %p1618_p11 = scmp.ne.s32.totalorder %s23_s16, %s1617_s1  ;;  %p1623_p13 = scmp.lt.s32.totalorder %s1617_s1, %s1617_s1 }
  0x1f   :  { %p1624_p0 = por %p1623_p13, %p1622_p12 }
  0x21   :  { %p1625_p1 = pnand %p1624_p0, %p1618_p11 }
  0x23   :  { %1628 = shalt.err (!%p1625_p1)
}
  0x24   :  { %25 = dma.hbm_to_vmem [thread:$0]  %s1858_s0, 224, %s23_s16, [#allocation3]  }
  0x25   :  { %s1629_s30 = scalar_lea.hbm %s1861_s3, 2048 }
  0x26   :  { %p1630_p2 = scmp.ne.s32.totalorder %s1861_s3, %s1629_s30  ;;  %p1633_p3 = scmp.lt.u32.totalorder %s1629_s30, %s1861_s3 }
  0x28   :  { %p1635_p4 = pnand %p1633_p3, %p1630_p2 }
  0x2a   :  { %1638 = shalt.err (!%p1635_p4)
}
  0x2b   :  { %s1639_s12 = scalar_lea.vmem %s46_s18, 2048  ;;  %p1644_p6 = scmp.lt.s32.totalorder %s46_s18, %s46_s18 }
  0x2c   :  { %p1640_p5 = scmp.ne.s32.totalorder %s46_s18, %s1639_s12  ;;  %p1645_p7 = scmp.lt.s32.totalorder %s1639_s12, %s1639_s12 }
  0x2e   :  { %p1646_p8 = por %p1645_p7, %p1644_p6 }
  0x30   :  { %p1647_p9 = pnand %p1646_p8, %p1640_p5 }
  0x32   :  { %1650 = shalt.err (!%p1647_p9)
}
  0x33   :  { %s1708_s0 = smov 64   ;;  %s1709_s13 = smov 4  }
  0x34   :  { %51 = dma.hbm_to_vmem [thread:$0]  %s1861_s3, 2048, %s46_s18, [#allocation6], %s1708_s0, %s1708_s0, %s1709_s13  }
  0x35   :  { %s1710_s16 = smov [#allocation8]   ;;  %s1651_s21 = scalar_lea.hbm %s1863_s5, 1024 }
  0x36   :  { %s59_s17 = sshll.u32 %s1710_s16, 4  ;;  %p1652_p10 = scmp.ne.s32.totalorder %s1863_s5, %s1651_s21  ;;  %s60_s17 = int_to_ptr.vmem [resolvable:$true] %s59_s17 }
  0x37   :  { %p1655_p11 = scmp.lt.u32.totalorder %s1651_s21, %s1863_s5 }
  0x39   :  { %p1657_p12 = pnand %p1655_p11, %p1652_p10 }
  0x3b   :  { %1660 = shalt.err (!%p1657_p12)
}
  0x3c   :  { %s1661_s1 = scalar_lea.vmem %s60_s17, 1024  ;;  %p1666_p0 = scmp.lt.s32.totalorder %s60_s17, %s60_s17 }
  0x3d   :  { %p1662_p13 = scmp.ne.s32.totalorder %s60_s17, %s1661_s1  ;;  %p1667_p1 = scmp.lt.s32.totalorder %s1661_s1, %s1661_s1 }
  0x3f   :  { %p1668_p2 = por %p1667_p1, %p1666_p0 }
  0x41   :  { %p1669_p3 = pnand %p1668_p2, %p1662_p13 }
  0x43   :  { %1672 = shalt.err (!%p1669_p3)
}
  0x44   :  { %65 = dma.hbm_to_vmem [thread:$0]  %s1863_s5, 1024, %s60_s17, [#allocation9], %s1708_s0, %s1708_s0, %s1709_s13  }
  0x45   :  { %1695 = dma.done.wait [#allocation3], 224  }
  0x46   :  { %1696 = vsyncadd [#allocation3], 4294967072 }
  0x47   :  { %1697 = dma.done.wait [#allocation6], 14592  }
  0x48   :  { %1698 = vsyncadd [#allocation6], 4294952704 }
  0x49   :  { %1699 = dma.done.wait [#allocation9], 1024  }
  0x4a   :  { %1700 = vsyncadd [#allocation9], 4294966272  ;;  %v1412_v0 = vld [vmem:[#allocation5 + $0x104] ss:$8 sps:$4 sm:$0xff]   ;;  %v1414_v1 = vld [vmem:[#allocation5 + $0x100] ss:$8 sps:$4 sm:$0xff]   ;;  %v89_v11 = vlaneseq }
  0x4b   :  { %777 = vmatprep.subr.bf16.mxu0 %v1412_v0  ;;  %v1415_v2 = vld [vmem:[#allocation5 + $0x114] ss:$8 sps:$4 sm:$0xff]   ;;  %v1417_v3 = vld [vmem:[#allocation5 + $0x110] ss:$8 sps:$4 sm:$0xff]   ;;  %v1418_v4 = vld [vmem:[#allocation5 + $0x124] ss:$8 sps:$4 sm:$0xff]  }
  0x4c   :  { %778 = vmatpush1.bf16.msra.mxu0 %v1414_v1  ;;  %v1420_v5 = vld [vmem:[#allocation5 + $0x120] ss:$8 sps:$4 sm:$0xff]   ;;  %v1421_v6 = vld [vmem:[#allocation5 + $0x134] ss:$8 sps:$4 sm:$0xff]   ;;  %v1423_v7 = vld [vmem:[#allocation5 + $0x130] ss:$8 sps:$4 sm:$0xff]  }
  0x4d   :  { %779 = vmatprep.subr.bf16.mxu0 %v1415_v2  ;;  %v1424_v8 = vld [vmem:[#allocation5 + $0x144] ss:$8 sps:$4 sm:$0xff]   ;;  %v1711_v9 = vmov 1983009808   ;;  %v1426_v12 = vld [vmem:[#allocation5 + $0x140] ss:$8 sps:$4 sm:$0xff]  }
  0x4e   :  { %v87_v10 = vunpack.c.l.s4 %v1711_v9  ;;  %v1427_v13 = vld [vmem:[#allocation5 + $0x154] ss:$8 sps:$4 sm:$0xff]   ;;  %v1804_v15 = vshrl.u32 %v89_v11, 7  ;;  %v1429_v16 = vld [vmem:[#allocation5 + $0x150] ss:$8 sps:$4 sm:$0xff]   ;;  %vm732_vm0 = vcmask 130048  }
  0x4f   :  { %v1430_v17 = vld [vmem:[#allocation5 + $0x164] ss:$8 sps:$4 sm:$0xff]   ;;  %v81_v19 = vld [vmem:[#allocation2] sm:$0xff]  ;;  %v1432_v22 = vld [vmem:[#allocation5 + $0x160] ss:$8 sps:$4 sm:$0xff]   ;;  %vm1714_vm1 = vmmov 0  }
  0x50   :  { %780 = vmatpush1.bf16.msra.mxu0 %v1417_v3  ;;  %v88_v14 = vunpack.c.0.s8 %v87_v10  ;;  %v85_v20 = vcombine.high %v81_v19, %v81_v19  ;;  %v1433_v23 = vld [vmem:[#allocation5 + $0x174] ss:$8 sps:$4 sm:$0xff]   ;;  %v1467_v26 = vld [vmem:[#allocation5 + $0x4] ss:$8 sps:$4 sm:$0xff]   ;;  %v1435_v27 = vld [vmem:[#allocation5 + $0x170] ss:$8 sps:$4 sm:$0xff]  }
  0x51   :  { %781 = vmatprep.subr.bf16.mxu0 %v1418_v4  ;;  %v1472_v29 = vld [vmem:[#allocation5] ss:$8 sps:$4 sm:$0xff]   ;;  %736 = vmatprep.subr.bf16.mxu1 %v1467_v26  ;;  %v1473_v31 = vld [vmem:[#allocation5 + $0x14] ss:$8 sps:$4 sm:$0xff]   ;;  %v1436_v32 = vld [vmem:[#allocation5 + $0x184] ss:$8 sps:$4 sm:$0xff]  }
  0x52   :  { %v1807_v18 = vsub.s32 %v88_v14, %v1804_v15  ;;  %737 = vmatpush1.bf16.msra.mxu1 %v1472_v29  ;;  %v1478_v34 = vld [vmem:[#allocation5 + $0x10] ss:$8 sps:$4 sm:$0xff]   ;;  %v1479_v35 = vld [vmem:[#allocation5 + $0x24] ss:$8 sps:$4 sm:$0xff]   ;;  %v1438_v36 = vld [vmem:[#allocation5 + $0x180] ss:$8 sps:$4 sm:$0xff]  }
  0x53   :  { %738 = vmatprep.subr.bf16.mxu1 %v1473_v31  ;;  %v1439_v37 = vld [vmem:[#allocation5 + $0x194] ss:$8 sps:$4 sm:$0xff]   ;;  %v1484_v38 = vld [vmem:[#allocation5 + $0x20] ss:$8 sps:$4 sm:$0xff]   ;;  %v1441_v40 = vld [vmem:[#allocation5 + $0x190] ss:$8 sps:$4 sm:$0xff]  }
  0x54   :  { %782 = vmatpush1.bf16.msra.mxu0 %v1420_v5  ;;  %v1810_v21 = vrot.slane %v81_v19, %v1807_v18  ;;  %v1813_v24 = vrot.slane %v85_v20, %v1807_v18  ;;  %v1485_v39 = vld [vmem:[#allocation5 + $0x34] ss:$8 sps:$4 sm:$0xff]   ;;  %v1442_v41 = vld [vmem:[#allocation5 + $0x1a4] ss:$8 sps:$4 sm:$0xff]   ;;  %v1490_v42 = vld [vmem:[#allocation5 + $0x30] ss:$8 sps:$4 sm:$0xff]  }
  0x55   :  { %783 = vmatprep.subr.bf16.mxu0 %v1421_v6  ;;  %v1491_v43 = vld [vmem:[#allocation5 + $0x44] ss:$8 sps:$4 sm:$0xff]   ;;  %v1444_v44 = vld [vmem:[#allocation5 + $0x1a0] ss:$8 sps:$4 sm:$0xff]   ;;  %v1445_v45 = vld [vmem:[#allocation5 + $0x1b4] ss:$8 sps:$4 sm:$0xff]  }
  0x56   :  { %v100_v25 = vcombine.high %v1810_v21, %v1810_v21  ;;  %v101_v28 = vcombine.high %v1813_v24, %v1813_v24  ;;  %739 = vmatpush1.bf16.msra.mxu1 %v1478_v34  ;;  %v1496_v46 = vld [vmem:[#allocation5 + $0x40] ss:$8 sps:$4 sm:$0xff]   ;;  %v1497_v47 = vld [vmem:[#allocation5 + $0x54] ss:$8 sps:$4 sm:$0xff]   ;;  %v1447_v48 = vld [vmem:[#allocation5 + $0x1b0] ss:$8 sps:$4 sm:$0xff]   ;;  %v127_v5 = vpack.c.bf16 %v1813_v24, %v1813_v24 }
  0x57   :  { %740 = vmatprep.subr.bf16.mxu1 %v1479_v35  ;;  %v1448_v49 = vld [vmem:[#allocation5 + $0x1c4] ss:$8 sps:$4 sm:$0xff]   ;;  %v1502_v50 = vld [vmem:[#allocation5 + $0x50] ss:$8 sps:$4 sm:$0xff]   ;;  %v1450_v52 = vld [vmem:[#allocation5 + $0x1c0] ss:$8 sps:$4 sm:$0xff]  }
  0x58   :  { %784 = vmatpush1.bf16.msra.mxu0 %v1423_v7  ;;  %v126_v30 = vpack.c.bf16 %v100_v25, %v100_v25  ;;  %v128_v33 = vpack.c.bf16 %v101_v28, %v101_v28  ;;  %v1503_v51 = vld [vmem:[#allocation5 + $0x64] ss:$8 sps:$4 sm:$0xff]   ;;  %v1451_v53 = vld [vmem:[#allocation5 + $0x1d4] ss:$8 sps:$4 sm:$0xff]   ;;  %v1508_v54 = vld [vmem:[#allocation5 + $0x60] ss:$8 sps:$4 sm:$0xff]  }
  0x59   :  { %785 = vmatprep.subr.bf16.mxu0 %v1424_v8  ;;  %v1509_v55 = vld [vmem:[#allocation5 + $0x74] ss:$8 sps:$4 sm:$0xff]   ;;  %v1453_v56 = vld [vmem:[#allocation5 + $0x1d0] ss:$8 sps:$4 sm:$0xff]   ;;  %v1454_v57 = vld [vmem:[#allocation5 + $0x1e4] ss:$8 sps:$4 sm:$0xff]  }
  0x5a   :  { %768 = vmatprep.mubr.bf16.mxu1 %v126_v30  ;;  %809 = vmatprep.mubr.bf16.mxu0 %v128_v33  ;;  %v1514_v58 = vld [vmem:[#allocation5 + $0x70] ss:$8 sps:$4 sm:$0xff]   ;;  %v1515_v59 = vld [vmem:[#allocation5 + $0x84] ss:$8 sps:$4 sm:$0xff]   ;;  %v1456_v60 = vld [vmem:[#allocation5 + $0x1e0] ss:$8 sps:$4 sm:$0xff]  }
  0x5b   :  { %741 = vmatpush1.bf16.msra.mxu1 %v1484_v38  ;;  %v1457_v61 = vld [vmem:[#allocation5 + $0x1f4] ss:$8 sps:$4 sm:$0xff]   ;;  %v1520_v62 = vld [vmem:[#allocation5 + $0x80] ss:$8 sps:$4 sm:$0xff]   ;;  %v1459_v0 = vld [vmem:[#allocation5 + $0x1f0] ss:$8 sps:$4 sm:$0xff]   ;;  %v125_v38 = vpack.c.bf16 %v1810_v21, %v1810_v21 }
  0x5c   :  { %786 = vmatpush1.bf16.msra.mxu0 %v1426_v12  ;;  %742 = vmatprep.subr.bf16.mxu1 %v1485_v39  ;;  %v1521_v63 = vld [vmem:[#allocation5 + $0x94] ss:$8 sps:$4 sm:$0xff]   ;;  %v1463_v1 = vld [vmem:[#allocation5 + $0x204] ss:$8 sps:$4 sm:$0xff]   ;;  %v1526_v2 = vld [vmem:[#allocation5 + $0x90] ss:$8 sps:$4 sm:$0xff]  }
  0x5d   :  { %787 = vmatprep.subr.bf16.mxu0 %v1427_v13  ;;  %v1527_v3 = vld [vmem:[#allocation5 + $0xa4] ss:$8 sps:$4 sm:$0xff]   ;;  %v82_v4 = vld [vmem:[#allocation2 + $0x8] sm:$0x3f]  ;;  %v1461_v8 = vld [vmem:[#allocation5 + $0x200] ss:$8 sps:$4 sm:$0xff]  }
  0x5e   :  { %v102_v6 = vcombine.high %v82_v4, %v82_v4  ;;  %v1822_v7 = vrot.slane %v82_v4, %v1807_v18  ;;  %v1466_v9 = vld [vmem:[#allocation5 + $0x214] ss:$8 sps:$4 sm:$0xff]   ;;  %v1532_v10 = vld [vmem:[#allocation5 + $0xa0] ss:$8 sps:$4 sm:$0xff]   ;;  %v1464_v14 = vld [vmem:[#allocation5 + $0x210] ss:$8 sps:$4 sm:$0xff]  }
  0x5f   :  { %743 = vmatpush1.bf16.msra.mxu1 %v1490_v42  ;;  %v1533_v13 = vld [vmem:[#allocation5 + $0xb4] ss:$8 sps:$4 sm:$0xff]   ;;  %v1538_v19 = vld [vmem:[#allocation5 + $0xb0] ss:$8 sps:$4 sm:$0xff]   ;;  %v1539_v20 = vld [vmem:[#allocation5 + $0xc4] ss:$8 sps:$4 sm:$0xff]  }
  0x60   :  { %788 = vmatpush1.bf16.msra.mxu0 %v1429_v16  ;;  %744 = vmatprep.subr.bf16.mxu1 %v1491_v43  ;;  %v1825_v11 = vrot.slane %v102_v6, %v1807_v18  ;;  %v117_v12 = vcombine.high %v1822_v7, %v1822_v7  ;;  %v1477_v18 = vld [vmem:[#allocation5 + $0x234] ss:$8 sps:$4 sm:$0xff]   ;;  %v1475_v24 = vld [vmem:[#allocation5 + $0x230] ss:$8 sps:$4 sm:$0xff]   ;;  %v1483_v26 = vld [vmem:[#allocation5 + $0x244] ss:$8 sps:$4 sm:$0xff]  }
  0x61   :  { %789 = vmatprep.subr.bf16.mxu0 %v1430_v17  ;;  %v1471_v17 = vld [vmem:[#allocation5 + $0x224] ss:$8 sps:$4 sm:$0xff]   ;;  %v1545_v25 = vld [vmem:[#allocation5 + $0xd4] ss:$8 sps:$4 sm:$0xff]   ;;  %v1481_v29 = vld [vmem:[#allocation5 + $0x240] ss:$8 sps:$4 sm:$0xff]  }
  0x62   :  { %v130_v16 = vpack.c.bf16 %v117_v12, %v117_v12  ;;  %v1552_v28 = vld [vmem:[#allocation5 + $0xe4] ss:$8 sps:$4 sm:$0xff]   ;;  %v1489_v30 = vld [vmem:[#allocation5 + $0x254] ss:$8 sps:$4 sm:$0xff]   ;;  %v1557_v31 = vld [vmem:[#allocation5 + $0xe0] ss:$8 sps:$4 sm:$0xff]  }
  0x63   :  { %745 = vmatpush1.bf16.msra.mxu1 %v1496_v46  ;;  %v1487_v33 = vld [vmem:[#allocation5 + $0x250] ss:$8 sps:$4 sm:$0xff]   ;;  %v1495_v34 = vld [vmem:[#allocation5 + $0x264] ss:$8 sps:$4 sm:$0xff]   ;;  %v1501_v39 = vld [vmem:[#allocation5 + $0x274] ss:$8 sps:$4 sm:$0xff]  }
  0x64   :  { %790 = vmatpush1.bf16.msra.mxu0 %v1432_v22  ;;  %746 = vmatprep.subr.bf16.mxu1 %v1497_v47  ;;  %v1469_v22 = vld [vmem:[#allocation5 + $0x220] ss:$8 sps:$4 sm:$0xff]   ;;  %v1560_v35 = vld [vmem:[#allocation5 + $0xf0] ss:$8 sps:$4 sm:$0xff]   ;;  %v1507_v43 = vld [vmem:[#allocation5 + $0x284] ss:$8 sps:$4 sm:$0xff]  }
  0x65   :  { %791 = vmatprep.subr.bf16.mxu0 %v1433_v23  ;;  %v1544_v23 = vld [vmem:[#allocation5 + $0xc0] ss:$8 sps:$4 sm:$0xff]   ;;  %v1499_v42 = vld [vmem:[#allocation5 + $0x270] ss:$8 sps:$4 sm:$0xff]   ;;  %v1513_v47 = vld [vmem:[#allocation5 + $0x294] ss:$8 sps:$4 sm:$0xff]  }
  0x66   :  { %v1505_v46 = vld [vmem:[#allocation5 + $0x280] ss:$8 sps:$4 sm:$0xff]   ;;  %v1712_v4 = vmov 0   ;;  %v1571_v6 = vld [vmem:[#allocation7 + $0x68] sm:$0xff]   ;;  %s1715_s30 = smov [#allocation10]   ;;  %vm1192_vm2 = vcmask 74752  }
  0x67   :  { %747 = vmatpush1.bf16.msra.mxu1 %v1502_v50  ;;  %v1566_v21 = vld [vmem:[#allocation7 + $0x10] sm:$0xff]   ;;  %v1576_v12 = vld [vmem:[#allocation7 + $0x38] sm:$0xff]   ;;  %s1200_s8 = sshll.u32 %s1715_s30, 4  ;;  %s1201_s8 = int_to_ptr.vmem [resolvable:$true] %s1200_s8 }
  0x68   :  { %792 = vmatpush1.bf16.msra.mxu0 %v1435_v27  ;;  %748 = vmatprep.subr.bf16.mxu1 %v1503_v51  ;;  %v1550_v27 = vld [vmem:[#allocation5 + $0xd0] ss:$8 sps:$4 sm:$0xff]   ;;  %v1519_v50 = vld [vmem:[#allocation5 + $0x2a4] ss:$8 sps:$4 sm:$0xff]   ;;  %p1678_p5 = scmp.lt.s32.totalorder %s1201_s8, %s1201_s8 }
  0x69   :  { %793 = vmatprep.subr.bf16.mxu0 %v1436_v32  ;;  %v1558_v32 = vld [vmem:[#allocation5 + $0xf4] ss:$8 sps:$4 sm:$0xff]   ;;  %v1568_v51 = vld [vmem:[#allocation7 + $0x18] sm:$0xff]  }
  0x6b   :  { %749 = vmatpush1.bf16.msra.mxu1 %v1508_v54  ;;  %v1525_v54 = vld [vmem:[#allocation5 + $0x2b4] ss:$8 sps:$4 sm:$0xff]  }
  0x6c   :  { %794 = vmatpush1.bf16.msra.mxu0 %v1438_v36  ;;  %750 = vmatprep.subr.bf16.mxu1 %v1509_v55  ;;  %v1561_v36 = vld [vmem:[#allocation7 + $0x40] sm:$0xff]  }
  0x6d   :  { %795 = vmatprep.subr.bf16.mxu0 %v1439_v37  ;;  %v1493_v37 = vld [vmem:[#allocation5 + $0x260] ss:$8 sps:$4 sm:$0xff]   ;;  %v1570_v55 = vld [vmem:[#allocation7 + $0x20] sm:$0xff]  }
  0x6f   :  { %751 = vmatpush1.bf16.msra.mxu1 %v1514_v58  ;;  %v1529_v58 = vld [vmem:[#allocation5 + $0x2c0] ss:$8 sps:$4 sm:$0xff]  }
  0x70   :  { %796 = vmatpush1.bf16.msra.mxu0 %v1441_v40  ;;  %752 = vmatprep.subr.bf16.mxu1 %v1515_v59  ;;  %v1562_v40 = vld [vmem:[#allocation7] sm:$0xff]  }
  0x71   :  { %797 = vmatprep.subr.bf16.mxu0 %v1442_v41  ;;  %v1563_v41 = vld [vmem:[#allocation7 + $0x48] sm:$0xff]  }
  0x72   :  { %v1537_v59 = vld [vmem:[#allocation5 + $0x2d4] ss:$8 sps:$4 sm:$0xff]  }
  0x73   :  { %753 = vmatpush1.bf16.msra.mxu1 %v1520_v62  ;;  %v1541_v62 = vld [vmem:[#allocation5 + $0x2e0] ss:$8 sps:$4 sm:$0xff]  }
  0x74   :  { %798 = vmatpush1.bf16.msra.mxu0 %v1444_v44  ;;  %754 = vmatprep.subr.bf16.mxu1 %v1521_v63  ;;  %v1564_v44 = vld [vmem:[#allocation7 + $0x8] sm:$0xff]  }
  0x75   :  { %799 = vmatprep.subr.bf16.mxu0 %v1445_v45  ;;  %v1565_v45 = vld [vmem:[#allocation7 + $0x50] sm:$0xff]   ;;  %v1549_v63 = vld [vmem:[#allocation5 + $0x2f4] ss:$8 sps:$4 sm:$0xff]  }
  0x77   :  { %755 = vmatpush1.bf16.msra.mxu1 %v1526_v2  ;;  %v129_v2 = vpack.c.bf16 %v1822_v7, %v1822_v7  ;;  %v1575_v7 = vld [vmem:[#allocation7 + $0x78] sm:$0xff]  }
  0x78   :  { %800 = vmatpush1.bf16.msra.mxu0 %v1447_v48  ;;  %756 = vmatprep.subr.bf16.mxu1 %v1527_v3  ;;  %v1567_v48 = vld [vmem:[#allocation7 + $0x58] sm:$0xff]  }
  0x79   :  { %801 = vmatprep.subr.bf16.mxu0 %v1448_v49  ;;  %v1511_v49 = vld [vmem:[#allocation5 + $0x290] ss:$8 sps:$4 sm:$0xff]   ;;  %v1554_v3 = vld [vmem:[#allocation5 + $0x300] ss:$8 sps:$4 sm:$0xff]  }
  0x7b   :  { %757 = vmatpush1.bf16.msra.mxu1 %v1532_v10  ;;  %v1574_v10 = vld [vmem:[#allocation7 + $0x30] sm:$0xff]  }
  0x7c   :  { %802 = vmatpush1.bf16.msra.mxu0 %v1450_v52  ;;  %758 = vmatprep.subr.bf16.mxu1 %v1533_v13  ;;  %v1569_v52 = vld [vmem:[#allocation7 + $0x60] sm:$0xff]   ;;  %v1713_v13 = vmov 0.0  }
  0x7d   :  { %803 = vmatprep.subr.bf16.mxu0 %v1451_v53  ;;  %v1517_v53 = vld [vmem:[#allocation5 + $0x2a0] ss:$8 sps:$4 sm:$0xff]  }
  0x7f   :  { %759 = vmatpush1.bf16.msra.mxu1 %v1538_v19  ;;  %v234_v19 = vsub.s32 0, %v1804_v15 }
  0x80   :  { %804 = vmatpush1.bf16.msra.mxu0 %v1453_v56  ;;  %760 = vmatprep.subr.bf16.mxu1 %v1539_v20  ;;  %v1523_v56 = vld [vmem:[#allocation5 + $0x2b0] ss:$8 sps:$4 sm:$0xff]  }
  0x81   :  { %805 = vmatprep.subr.bf16.mxu0 %v1454_v57  ;;  %v1531_v57 = vld [vmem:[#allocation5 + $0x2c4] ss:$8 sps:$4 sm:$0xff]   ;;  %v230_v20 = vld [vmem:[%s1860_s2] sm:$0x3] }
  0x83   :  { %761 = vmatpush1.bf16.msra.mxu1 %v1544_v23 }
  0x84   :  { %806 = vmatpush1.bf16.msra.mxu0 %v1456_v60  ;;  %762 = vmatprep.subr.bf16.mxu1 %v1545_v25  ;;  %v1535_v60 = vld [vmem:[#allocation5 + $0x2d0] ss:$8 sps:$4 sm:$0xff]  }
  0x85   :  { %807 = vmatprep.subr.bf16.mxu0 %v1457_v61  ;;  %v1543_v61 = vld [vmem:[#allocation5 + $0x2e4] ss:$8 sps:$4 sm:$0xff]  }
  0x87   :  { %763 = vmatpush1.bf16.msra.mxu1 %v1550_v27 }
  0x88   :  { %808 = vmatpush1.bf16.msra.mxu0 %v1459_v0  ;;  %764 = vmatprep.subr.bf16.mxu1 %v1552_v28  ;;  %v1547_v0 = vld [vmem:[#allocation5 + $0x2f0] ss:$8 sps:$4 sm:$0xff]  }
  0x89   :  { %818 = vmatprep.subr.bf16.mxu0 %v1463_v1  ;;  %v1556_v1 = vld [vmem:[#allocation5 + $0x304] ss:$8 sps:$4 sm:$0xff]  }
  0x8b   :  { %810 = vmatmul.mubr.bf16.vlgmr.msra.gmra.mrb[0].mxu0 %v127_v5  ;;  %765 = vmatpush1.bf16.msra.mxu1 %v1557_v31  ;;  %v131_v5 = vpack.c.bf16 %v1825_v11, %v1825_v11 }
  0x8c   :  { %819 = vmatpush1.bf16.msra.mxu0 %v1461_v8  ;;  %850 = vmatprep.mubr.bf16.mxu0 %v130_v16  ;;  %v1572_v8 = vld [vmem:[#allocation7 + $0x28] sm:$0xff]  }
  0x8d   :  { %820 = vmatprep.subr.bf16.mxu0 %v1466_v9  ;;  %766 = vmatprep.subr.bf16.mxu1 %v1558_v32  ;;  %v1573_v9 = vld [vmem:[#allocation7 + $0x70] sm:$0xff]  }
  0x8f   :  { %767 = vmatpush1.bf16.msra.mxu1 %v1560_v35  ;;  %v1577_v35 = vld [vmem:[#allocation8] sm:$0xff]  }
  0x90   :  { %821 = vmatpush1.bf16.msra.mxu0 %v1464_v14  ;;  %1336 = vmatprep.subr.bf16.mxu1 %v1561_v36 }
  0x91   :  { %822 = vmatprep.subr.bf16.mxu0 %v1471_v17 }
  0x92   :  { %769 = vmatmul.mubr.bf16.vlgmr.msra.gmra.mrb[0].mxu1 %v125_v38  ;;  %v1580_v38 = vld [vmem:[#allocation8 + $0x18] sm:$0xff]  }
  0x93   :  { %1337 = vmatpush3.bf16.msra.mxu1 %v1562_v40  ;;  %v1582_v40 = vld [vmem:[#allocation8 + $0x28] sm:$0xff]  }
  0x94   :  { %823 = vmatpush1.bf16.msra.mxu0 %v1469_v22  ;;  %1338 = vmatprep.subr.bf16.mxu1 %v1563_v41  ;;  %v238_v22 = vsub.s32 1, %v1804_v15  ;;  %v1579_v15 = vld [vmem:[#allocation8 + $0x10] sm:$0xff]  }
  0x95   :  { %824 = vmatprep.subr.bf16.mxu0 %v1477_v18  ;;  %v235_v18 = vrot.slane %v230_v20, %v234_v19  ;;  %v1583_v41 = vld [vmem:[#allocation8 + $0x30] sm:$0xff]  }
  0x96   :  { %v239_v23 = vrot.slane %v230_v20, %v238_v22 }
  0x97   :  { %1339 = vmatpush3.bf16.msra.mxu1 %v1564_v44  ;;  %v1310_v44 = vld [vmem:[%s1862_s4] ss:$0 sm:$0xff]  ;;  %s1673_s4 = scalar_lea.vmem %s1201_s8, 32 }
  0x98   :  { %825 = vmatpush1.bf16.msra.mxu0 %v1475_v24  ;;  %1340 = vmatprep.subr.bf16.mxu1 %v1565_v45  ;;  %p1674_p4 = scmp.ne.s32.totalorder %s1201_s8, %s1673_s4  ;;  %p1679_p6 = scmp.lt.s32.totalorder %s1673_s4, %s1673_s4 }
  0x99   :  { %826 = vmatprep.subr.bf16.mxu0 %v1483_v26 }
  0x9a   :  { %p1680_p7 = por %p1679_p6, %p1678_p5 }
  0x9b   :  { %1341 = vmatpush3.bf16.msra.mxu1 %v1566_v21 }
  0x9c   :  { %827 = vmatpush1.bf16.msra.mxu0 %v1481_v29  ;;  %1342 = vmatprep.subr.bf16.mxu1 %v1567_v48  ;;  %p1681_p8 = pnand %p1680_p7, %p1674_p4 }
  0x9d   :  { %828 = vmatprep.subr.bf16.mxu0 %v1489_v30 }
  0x9f   :  { %1343 = vmatpush3.bf16.msra.mxu1 %v1568_v51  ;;  %v1327_v51 = vld [vmem:[%s1864_s6] ss:$0 sm:$0xff] }
  0xa0   :  { %829 = vmatpush1.bf16.msra.mxu0 %v1487_v33  ;;  %1344 = vmatprep.subr.bf16.mxu1 %v1569_v52 }
  0xa1   :  { %830 = vmatprep.subr.bf16.mxu0 %v1495_v34 }
  0xa3   :  { %1345 = vmatpush3.bf16.msra.mxu1 %v1570_v55 }
  0xa4   :  { %831 = vmatpush1.bf16.msra.mxu0 %v1493_v37  ;;  %1346 = vmatprep.subr.bf16.mxu1 %v1571_v6  ;;  %v1578_v37 = vld [vmem:[#allocation8 + $0x8] sm:$0xff]  }
  0xa5   :  { %832 = vmatprep.subr.bf16.mxu0 %v1501_v39  ;;  %v1581_v39 = vld [vmem:[#allocation8 + $0x20] sm:$0xff]  }
  0xa7   :  { %1347 = vmatpush3.bf16.msra.mxu1 %v1572_v8 }
  0xa8   :  { %833 = vmatpush1.bf16.msra.mxu0 %v1499_v42  ;;  %1348 = vmatprep.subr.bf16.mxu1 %v1573_v9  ;;  %v1584_v42 = vld [vmem:[#allocation8 + $0x38] sm:$0xff]  }
  0xa9   :  { %834 = vmatprep.subr.bf16.mxu0 %v1507_v43 }
  0xab   :  { %1349 = vmatpush3.bf16.msra.mxu1 %v1574_v10 }
  0xac   :  { %835 = vmatpush1.bf16.msra.mxu0 %v1505_v46  ;;  %1350 = vmatprep.subr.bf16.mxu1 %v1575_v7 }
  0xad   :  { %836 = vmatprep.subr.bf16.mxu0 %v1513_v47 }
  0xaf   :  { %1351 = vmatpush3.bf16.msra.mxu1 %v1576_v12 }
  0xb0   :  { %837 = vmatpush1.bf16.msra.mxu0 %v1511_v49  ;;  %1367 = vmatprep.subr.bf16.mxu1 %v1713_v13 }
  0xb1   :  { %838 = vmatprep.subr.bf16.mxu0 %v1519_v50 }
  0xb4   :  { %839 = vmatpush1.bf16.msra.mxu0 %v1517_v53 }
  0xb5   :  { %840 = vmatprep.subr.bf16.mxu0 %v1525_v54 }
  0xb8   :  { %841 = vmatpush1.bf16.msra.mxu0 %v1523_v56 }
  0xb9   :  { %842 = vmatprep.subr.bf16.mxu0 %v1531_v57 }
  0xbc   :  { %843 = vmatpush1.bf16.msra.mxu0 %v1529_v58 }
  0xbd   :  { %844 = vmatprep.subr.bf16.mxu0 %v1537_v59 }
  0xc0   :  { %845 = vmatpush1.bf16.msra.mxu0 %v1535_v60 }
  0xc1   :  { %846 = vmatprep.subr.bf16.mxu0 %v1543_v61 }
  0xc4   :  { %847 = vmatpush1.bf16.msra.mxu0 %v1541_v62 }
  0xc5   :  { %848 = vmatprep.subr.bf16.mxu0 %v1549_v63 }
  0xc8   :  { %849 = vmatpush1.bf16.msra.mxu0 %v1547_v0 }
  0xc9   :  { %859 = vmatprep.subr.bf16.mxu0 %v1556_v1 }
  0xcb   :  { %851 = vmatmul.mubr.bf16.vlgmr.msra.gmra.mrb[0].mxu0 %v129_v2 }
  0xcc   :  { %860 = vmatpush1.bf16.msra.mxu0 %v1554_v3  ;;  %891 = vmatprep.mubr.bf16.mxu0 %v1712_v4 }
  0xd7   :  { %1309 = vmatmul.mubr.msk.bf16.vlgmr.msra.gmra.mrb[0].mxu0 %vm732_vm0, %v131_v5 }
 0x165   :  { %v770_v14 = vpop.f32.mrb[0].mxu1 }
 0x166   :  { %v772_v16 = vpop.f32.mrb[1].mxu1  ;;  %v771_v24 = vadd.f32 %v770_v14, %v235_v18 }
 0x167   :  { %v774_v17 = vpop.f32.mrb[2].mxu1  ;;  %v773_v25 = vadd.f32 %v772_v16, %v239_v23 }
 0x168   :  { %v775_v11 = vpop.f32.mrb[3].mxu1 }
 0x1aa   :  { %v893_v26 = vpop.f32.mrb[0].mxu0 }
 0x1ab   :  { %v1388_v27 = vadd.f32 %v893_v26, %v771_v24  ;;  %v895_v28 = vpop.f32.mrb[1].mxu0 }
 0x1ac   :  { %v1390_v29 = vadd.f32 %v895_v28, %v773_v25  ;;  %v897_v30 = vpop.f32.mrb[2].mxu0 }
 0x1ad   :  { %v900_v31 = vmax.f32 %v1388_v27, 0.0  ;;  %v898_v32 = vpop.f32.mrb[3].mxu0 }
 0x1ae   :  { %v901_v33 = vmax.f32 %v1390_v29, 0.0 }
 0x1af   :  { %v902_v36 = vpack.c.bf16 %v900_v31, %v900_v31 }
 0x1b0   :  { %v903_v34 = vpack.c.bf16 %v901_v33, %v901_v33 }
 0x1b2   :  { %1071 = vmatprep.mubr.bf16.mxu1 %v903_v34 }
 0x1b3   :  { %1072 = vmatmul.mubr.bf16.vlgmr.msra.gmra.mrb[4].mxu1 %v902_v36 }
 0x1b4   :  { %1368 = vmatpush3.bf16.msra.mxu1 %v1577_v35  ;;  %1383 = vmatprep.mubr.msk.bf16.mxu1 %vm1714_vm1, %v1713_v13 }
 0x1b5   :  { %1369 = vmatprep.subr.bf16.mxu1 %v1713_v13 }
 0x1b8   :  { %1370 = vmatpush3.bf16.msra.mxu1 %v1578_v37 }
 0x1b9   :  { %1371 = vmatprep.subr.bf16.mxu1 %v1713_v13 }
 0x1bc   :  { %1372 = vmatpush3.bf16.msra.mxu1 %v1579_v15 }
 0x1bd   :  { %1373 = vmatprep.subr.bf16.mxu1 %v1713_v13 }
 0x1c0   :  { %1374 = vmatpush3.bf16.msra.mxu1 %v1580_v38 }
 0x1c1   :  { %1375 = vmatprep.subr.bf16.mxu1 %v1713_v13 }
 0x1c4   :  { %1376 = vmatpush3.bf16.msra.mxu1 %v1581_v39 }
 0x1c5   :  { %1377 = vmatprep.subr.bf16.mxu1 %v1713_v13 }
 0x1c8   :  { %1378 = vmatpush3.bf16.msra.mxu1 %v1582_v40 }
 0x1c9   :  { %1379 = vmatprep.subr.bf16.mxu1 %v1713_v13 }
 0x1cc   :  { %1380 = vmatpush3.bf16.msra.mxu1 %v1583_v41 }
 0x1cd   :  { %1381 = vmatprep.subr.bf16.mxu1 %v1713_v13 }
 0x1d0   :  { %1382 = vmatpush3.bf16.msra.mxu1 %v1584_v42 }
 0x286   :  { %v1352_v43 = vpop.f32.mrb[4].mxu1 }
 0x287   :  { %v1353_v45 = vpop.f32.mrb[5].mxu1 }
 0x288   :  { %v1354_v46 = vadd.f32 %v1353_v45, %v1352_v43  ;;  %v1355_v47 = vpop.f32.mrb[6].mxu1 }
 0x289   :  { %v1356_v21 = vpop.f32.mrb[7].mxu1 }
 0x28a   :  { %v1074_v48 = vadd.f32 %v1354_v46, %v1310_v44 }
 0x28c   :  { %v1079_v49 = vmax.f32 %v1074_v48, 0.0 }
 0x28e   :  { %v1080_v50 = vpack.c.bf16 %v1079_v49, %v1079_v49 }
 0x290   :  { %1384 = vmatmul.mubr.bf16.vlgmr.msra.gmra.mrb[8].mxu1 %v1080_v50 }
 0x363   :  { %v1186_v52 = vpop.f32.mrb[8].mxu1 }
 0x364   :  { %v1187_v53 = vadd.f32 %v1327_v51, %v1186_v52  ;;  %v1385_v54 = vpop.f32.mrb[9].mxu1 }
 0x365   :  { %v1189_v55 = vpop.f32.mrb[10].mxu1 }
 0x366   :  { %v1386_v56 = vpop.f32.mrb[11].mxu1  ;;  %1193 = vst.msk [vmem:[#allocation10] sm:$0x3] %vm1192_vm2, %v1187_v53 }
 0x367   :  { %1684 = shalt.err (!%p1681_p8)
}
 0x368   :  { %s1685_s6 = scalar_lea.hbm %s1865_s7, 32 }
 0x369   :  { %p1686_p9 = scmp.ne.s32.totalorder %s1865_s7, %s1685_s6  ;;  %p1689_p10 = scmp.lt.u32.totalorder %s1685_s6, %s1865_s7 }
 0x36b   :  { %p1691_p11 = pnand %p1689_p10, %p1686_p9 }
 0x36d   :  { %1694 = shalt.err (!%p1691_p11)
}
 0x36e   :  { %1203 = dma.vmem_to_hbm [thread:$0]  %s1201_s8, 32, %s1865_s7, [#allocation4]  }
 0x36f   :  { %1701 = dma.done.wait [#allocation4], 32  }
 0x370   :  { %1702 = vsyncadd [#allocation4], 4294967264 }
 0x371   :  { %1207 = vsyncpa [#allocation3], 1 }
 0x372   :  { %1208 = vsyncpa [#allocation6], 1 }
 0x373   :  { %1209 = vsyncpa [#allocation9], 1 }
 0x374   :  { %1210 = vsyncpa [#allocation4], 1 }

</bundles_post_ra>
